<compile_context>
chip_gen: v5e
topology: v5e:2x2
jax: 0.10.0
libtpu: 0.0.40
codegen_flags: <defaults>
</compile_context>

<pallas_src>
import jax
import jax.numpy as jnp
from jax.experimental import pallas as pl
from jax.experimental.pallas import tpu as pltpu

IN_FEATURES = 784
HIDDEN = 512
OUT_FEATURES = 10


def _round_up(x, m):
    return ((x + m - 1) // m) * m


def _choose_tb(B):
    """Batch tile size. Large B -> 256/512 (MXU fill + step-overhead amortization);
    moderate B -> 2 tiles (both v7x TCs); tiny B -> one 16-rounded tile."""
    if B <= 32:
        return _round_up(B, 16)
    if B <= 256:
        return _round_up((B + 1) // 2, 16)       # >= 2 tiles for megacore
    if B <= 1024:
        return 256
    return 512


def mlp_kernel(x_ref, w1_ref, b1_ref, w2_ref, b2_ref, o_ref):
    # x_ref : (TB, 784) f32     w1_ref: (784, 512) bf16   b1_ref: (1, 512) f32
    # w2_ref: (512, 10) bf16    b2_ref: (1, 10)    f32    o_ref : (TB, 10) f32
    x = x_ref[...].astype(jnp.bfloat16)          # in-kernel cast (VPU), halves MXU feed
    # fc1 (+ bias), f32 accumulation on the MXU
    h = jnp.dot(x, w1_ref[...], preferred_element_type=jnp.float32) + b1_ref[...]
    h = jnp.maximum(h, 0.0)                      # ReLU
    # dropout (p=0.2) -> identity in eval mode
    # fc2: bf16 activations into the MXU, f32 accumulation
    y = jnp.dot(h.astype(jnp.bfloat16), w2_ref[...],
                preferred_element_type=jnp.float32) + b2_ref[...]
    o_ref[...] = y.astype(o_ref.dtype)


def prepare_params(w1, b1, w2, b2):
    """One-time parameter prep (hoisted out of the per-call path)."""
    w1_b = jnp.asarray(w1, jnp.float32).astype(jnp.bfloat16)      # (784, 512)
    w2_b = jnp.asarray(w2, jnp.float32).astype(jnp.bfloat16)      # (512, 10)
    b1_r = jnp.asarray(b1, jnp.float32).reshape(1, HIDDEN)
    b2_r = jnp.asarray(b2, jnp.float32).reshape(1, OUT_FEATURES)
    return w1_b, b1_r, w2_b, b2_r


def simple_forward(x_nchw, params):
    w1_b, b1_r, w2_b, b2_r = params
    B = x_nchw.shape[0]
    x_flat = x_nchw.reshape(B, -1).astype(jnp.float32)   # flatten(start_dim=1, end_dim=3)
    assert x_flat.shape[1] == IN_FEATURES

    TB = _choose_tb(B)
    B_pad = _round_up(B, TB)
    if B_pad != B:
        # Only the small tail is padded (zeros); padded rows are sliced off below.
        x_flat = jnp.pad(x_flat, ((0, B_pad - B), (0, 0)))

    grid = (B_pad // TB,)
    cost = pl.CostEstimate(
        flops=2 * B_pad * IN_FEATURES * HIDDEN + 2 * B_pad * HIDDEN * OUT_FEATURES,
        transcendentals=0,
        bytes_accessed=(x_flat.size * 4 + w1_b.size * 2 + w2_b.size * 2
                        + b1_r.size * 4 + b2_r.size * 4
                        + B_pad * OUT_FEATURES * 4),
    )

    out = pl.pallas_call(
        mlp_kernel,
        out_shape=jax.ShapeDtypeStruct((B_pad, OUT_FEATURES), jnp.float32),
        grid=grid,
        in_specs=[
            # x: tiled over the batch axis (K = full 784 extent, no padding copy)
            pl.BlockSpec((TB, IN_FEATURES), lambda i: (i, 0)),
            # weights/biases: constant index_map -> fetched once, VMEM-resident
            pl.BlockSpec((IN_FEATURES, HIDDEN), lambda i: (0, 0)),
            pl.BlockSpec((1, HIDDEN), lambda i: (0, 0)),
            pl.BlockSpec((HIDDEN, OUT_FEATURES), lambda i: (0, 0)),
            pl.BlockSpec((1, OUT_FEATURES), lambda i: (0, 0)),
        ],
        out_specs=pl.BlockSpec((TB, OUT_FEATURES), lambda i: (i, 0)),
        compiler_params=pltpu.CompilerParams(
            dimension_semantics=("parallel",),
        ),
        cost_estimate=cost,
    )(x_flat, w1_b, b1_r, w2_b, b2_r)
    return out[:B]


def init_params(key):
    # Deterministic init mimicking torch.nn.Linear default (uniform +/- 1/sqrt(fan_in))
    k1, k2, k3, k4 = jax.random.split(key, 4)
    bound1 = 1.0 / jnp.sqrt(784.0)
    bound2 = 1.0 / jnp.sqrt(512.0)
    w1 = jax.random.uniform(k1, (IN_FEATURES, HIDDEN), jnp.float32, -bound1, bound1)
    b1 = jax.random.uniform(k2, (HIDDEN,), jnp.float32, -bound1, bound1)
    w2 = jax.random.uniform(k3, (HIDDEN, OUT_FEATURES), jnp.float32, -bound2, bound2)
    b2 = jax.random.uniform(k4, (OUT_FEATURES,), jnp.float32, -bound2, bound2)
    return w1, b1, w2, b2


if __name__ == "__main__":
    key = jax.random.PRNGKey(0)
    kx, kp = jax.random.split(key)

    # MNIST-shaped input: (batch=2, channels=1, 28, 28), NCHW like PyTorch.
    x = jax.random.normal(kx, (2, 1, 28, 28), jnp.float32)
    w1, b1, w2, b2 = init_params(kp)

    params = prepare_params(w1, b1, w2, b2)      # one-time weight prep
    out = simple_forward(x, params)
    jax.block_until_ready(out)
    assert out.shape == (2, 10)

    # Reference in plain JAX with the same bf16 casts (eval-mode dropout = identity).
    x_flat = x.reshape(2, -1).astype(jnp.bfloat16)
    w1b = w1.astype(jnp.bfloat16)
    w2b = w2.astype(jnp.bfloat16)
    h_ref = jnp.dot(x_flat, w1b, preferred_element_type=jnp.float32) + b1[None, :]
    h_ref = jnp.maximum(h_ref, 0.0)
    ref = jnp.dot(h_ref.astype(jnp.bfloat16), w2b,
                  preferred_element_type=jnp.float32) + b2[None, :]
    assert jnp.allclose(out, ref, atol=1e-2, rtol=1e-2), (
        f"max abs err = {jnp.max(jnp.abs(out - ref))}")

    print("KERNEL_OK")
</pallas_src>

<mosaic_0001>
module attributes {stable_mosaic.version = 11 : i64} {
  func.func @mlp_kernel(%arg0: i32, %arg1: memref<16x784xf32, #tpu.memory_space<vmem>>, %arg2: memref<784x512xbf16, #tpu.memory_space<vmem>>, %arg3: memref<1x512xf32, #tpu.memory_space<vmem>>, %arg4: memref<512x10xbf16, #tpu.memory_space<vmem>>, %arg5: memref<1x10xf32, #tpu.memory_space<vmem>>, %arg6: memref<16x10xf32, #tpu.memory_space<vmem>>) attributes {dimension_semantics = [#tpu.dimension_semantics<parallel>], iteration_bounds = array<i64: 1>, scalar_prefetch = 0 : i64, scratch_operands = 0 : i64, tpu.core_type = #tpu.core_type<tc>, window_params = [{transform_indices = @transform_0, window_bounds = array<i64: 16, 784>}, {pipeline_mode = #tpu.pipeline_mode<synchronous>, transform_indices = @transform_1, window_bounds = array<i64: 784, 512>}, {pipeline_mode = #tpu.pipeline_mode<synchronous>, transform_indices = @transform_2, window_bounds = array<i64: 1, 512>}, {pipeline_mode = #tpu.pipeline_mode<synchronous>, transform_indices = @transform_3, window_bounds = array<i64: 512, 10>}, {pipeline_mode = #tpu.pipeline_mode<synchronous>, transform_indices = @transform_4, window_bounds = array<i64: 1, 10>}, {transform_indices = @transform_5, window_bounds = array<i64: 16, 10>}]} {
    %c0 = arith.constant 0 : index
    %c0_0 = arith.constant 0 : index
    %0 = vector.load %arg1[%c0, %c0_0] : memref<16x784xf32, #tpu.memory_space<vmem>>, vector<16x784xf32>
    %1 = arith.truncf %0 : vector<16x784xf32> to vector<16x784xbf16>
    %c0_1 = arith.constant 0 : index
    %c0_2 = arith.constant 0 : index
    %2 = vector.load %arg2[%c0_1, %c0_2] : memref<784x512xbf16, #tpu.memory_space<vmem>>, vector<784x512xbf16>
    %cst = arith.constant dense<0.000000e+00> : vector<16x512xf32>
    %3 = tpu.matmul %1, %2, %cst {dimension_numbers = #tpu.dot_dimension_numbers<[1], [0], [0], [1], [0, 0, 1, 1], [], []>} : vector<16x784xbf16>, vector<784x512xbf16>, vector<16x512xf32> -> vector<16x512xf32>
    %c0_3 = arith.constant 0 : index
    %c0_4 = arith.constant 0 : index
    %4 = vector.load %arg3[%c0_3, %c0_4] : memref<1x512xf32, #tpu.memory_space<vmem>>, vector<1x512xf32>
    %5 = vector.broadcast %4 : vector<1x512xf32> to vector<16x512xf32>
    %6 = arith.addf %3, %5 : vector<16x512xf32>
    %cst_5 = arith.constant 0.000000e+00 : f32
    %7 = vector.broadcast %cst_5 : f32 to vector<16x512xf32>
    %8 = arith.maximumf %6, %7 : vector<16x512xf32>
    %9 = arith.truncf %8 : vector<16x512xf32> to vector<16x512xbf16>
    %c0_6 = arith.constant 0 : index
    %c0_7 = arith.constant 0 : index
    %10 = vector.load %arg4[%c0_6, %c0_7] : memref<512x10xbf16, #tpu.memory_space<vmem>>, vector<512x10xbf16>
    %cst_8 = arith.constant dense<0.000000e+00> : vector<16x10xf32>
    %11 = tpu.matmul %9, %10, %cst_8 {dimension_numbers = #tpu.dot_dimension_numbers<[1], [0], [0], [1], [0, 0, 1, 1], [], []>} : vector<16x512xbf16>, vector<512x10xbf16>, vector<16x10xf32> -> vector<16x10xf32>
    %c0_9 = arith.constant 0 : index
    %c0_10 = arith.constant 0 : index
    %12 = vector.load %arg5[%c0_9, %c0_10] : memref<1x10xf32, #tpu.memory_space<vmem>>, vector<1x10xf32>
    %13 = vector.broadcast %12 : vector<1x10xf32> to vector<16x10xf32>
    %14 = arith.addf %11, %13 : vector<16x10xf32>
    %c0_11 = arith.constant 0 : index
    %c0_12 = arith.constant 0 : index
    %15 = vector.load %arg6[%c0_11, %c0_12] : memref<16x10xf32, #tpu.memory_space<vmem>>, vector<16x10xf32>
    tpu.vector_store %arg6[%c0_11, %c0_12], %14 {strides = array<i32>} : memref<16x10xf32, #tpu.memory_space<vmem>>, vector<16x10xf32>,
    return
  }
  func.func @transform_0(%arg0: i32) -> (i32, i32) {
    %c0_i32 = arith.constant 0 : i32
    %c0_i32_0 = arith.constant 0 : i32
    return %arg0, %c0_i32 : i32, i32
  }
  func.func @transform_1(%arg0: i32) -> (i32, i32) {
    %c0_i32 = arith.constant 0 : i32
    %c0_i32_0 = arith.constant 0 : i32
    %c0_i32_1 = arith.constant 0 : i32
    return %c0_i32, %c0_i32_0 : i32, i32
  }
  func.func @transform_2(%arg0: i32) -> (i32, i32) {
    %c0_i32 = arith.constant 0 : i32
    %c0_i32_0 = arith.constant 0 : i32
    %c0_i32_1 = arith.constant 0 : i32
    return %c0_i32, %c0_i32_0 : i32, i32
  }
  func.func @transform_3(%arg0: i32) -> (i32, i32) {
    %c0_i32 = arith.constant 0 : i32
    %c0_i32_0 = arith.constant 0 : i32
    %c0_i32_1 = arith.constant 0 : i32
    return %c0_i32, %c0_i32_0 : i32, i32
  }
  func.func @transform_4(%arg0: i32) -> (i32, i32) {
    %c0_i32 = arith.constant 0 : i32
    %c0_i32_0 = arith.constant 0 : i32
    %c0_i32_1 = arith.constant 0 : i32
    return %c0_i32, %c0_i32_0 : i32, i32
  }
  func.func @transform_5(%arg0: i32) -> (i32, i32) {
    %c0_i32 = arith.constant 0 : i32
    %c0_i32_0 = arith.constant 0 : i32
    return %arg0, %c0_i32 : i32, i32
  }
}

</mosaic_0001>

<bundles_post_ra>
// kernel: tpu_custom_call.1
= control target key start
LH: loop header
LB: loop body
LE: loop exit
PB: predicated region body
PF: predicated region fallthrough
CT: control target
= control target key end

     0   :  { %10 = vsyncpa [#allocation3], 0  ;;  %s3432_s0 = inlined_call_operand.vmem [shape: f32[16,784], index: 0, kind: input, shape index: {}]   ;;  %s3433_s1 = inlined_call_operand.hbm [shape: bf16[784,512], index: 1, kind: input, shape index: {}]   ;;  %s3434_s2 = inlined_call_operand.vmem [shape: f32[1,512], index: 2, kind: input, shape index: {}]   ;;  %s3435_s3 = inlined_call_operand.vmem [shape: bf16[512,10], index: 3, kind: input, shape index: {}]   ;;  %s3436_s4 = inlined_call_operand.vmem [shape: f32[1,10], index: 4, kind: input, shape index: {}]   ;;  %s3437_s5 = inlined_call_operand.hbm [shape: f32[16,10], index: 5, kind: output, shape index: {}]  }
   0x1   :  { %11 = vsyncpa [#allocation4], 0  ;;  %s18_s20 = sshll.u32 %s3433_s1, 4  ;;  %s3194_s21 = smov [#allocation2]   ;;  %s19_s20 = int_to_ptr.hbm [resolvable:$true] %s18_s20 }
   0x2   :  { %s20_s22 = sshll.u32 %s3194_s21, 4  ;;  %s3195_s23 = smov 256   ;;  %s21_s22 = int_to_ptr.vmem [resolvable:$true] %s20_s22 }
   0x3   :  { %s3196_s24 = smov 16  }
   0x4   :  { %26 = dma.hbm_to_vmem [thread:$0]  %s19_s20, 25088, %s21_s22, [#allocation3], %s3195_s23, %s3195_s23, %s3196_s24  }
   0x5   :  { %3190 = dma.done.wait [#allocation3], 25088  }
   0x6   :  { %3191 = vsyncadd [#allocation3], 4294942208  ;;  %v2105_v0 = vld [vmem:[#allocation2 + $0xe0] sm:$0xf]  ;;  %v2937_v1 = vld [vmem:[#allocation2 + $0xec] sm:$0xf0] }
   0x7   :  { %v2233_v2 = vld [vmem:[#allocation2 + $0x1e0] sm:$0xf]  ;;  %v2106_v3 = vor.u32 %v2937_v1, %v2105_v0  ;;  %v2969_v4 = vld [vmem:[#allocation2 + $0x1ec] sm:$0xf0]  ;;  %vm1245_vm0 = vcmask 130048   ;;  %vm1969_vm1 = vcmask 80896  }
   0x8   :  { %v2361_v5 = vld [vmem:[#allocation2 + $0x2e0] sm:$0xf]  ;;  %v3001_v6 = vld [vmem:[#allocation2 + $0x2ec] sm:$0xf0]  ;;  %v2234_v7 = vor.u32 %v2969_v4, %v2233_v2  ;;  %s3197_s10 = smov [#allocation5]   ;;  %s3198_s14 = smov 128  }
   0x9   :  { %v2362_v8 = vor.u32 %v3001_v6, %v2361_v5  ;;  %v2489_v9 = vld [vmem:[#allocation2 + $0x3e0] sm:$0xf]  ;;  %v3033_v10 = vld [vmem:[#allocation2 + $0x3ec] sm:$0xf0]  ;;  %1249 = vmatpush.bf16.msra.mxu0 %v2106_v3  ;;  %s1976_s11 = sshll.u32 %s3197_s10, 4  ;;  %s3199_s15 = smov 8   ;;  %s1977_s11 = int_to_ptr.vmem [resolvable:$true] %s1976_s11 }
   0xa   :  { %v2089_v11 = vld [vmem:[#allocation2 + $0xc0] sm:$0xf]  ;;  %v2490_v12 = vor.u32 %v3033_v10, %v2489_v9  ;;  %v2933_v13 = vld [vmem:[#allocation2 + $0xcc] sm:$0xf0]  ;;  %1263 = vmatpush.bf16.msra.mxu1 %v2234_v7 }
   0xb   :  { %v2217_v14 = vld [vmem:[#allocation2 + $0x1c0] sm:$0xf]  ;;  %v2965_v15 = vld [vmem:[#allocation2 + $0x1cc] sm:$0xf0]  ;;  %1277 = vmatpush.bf16.msra.mxu2 %v2362_v8  ;;  %v2090_v16 = vor.u32 %v2933_v13, %v2089_v11 }
   0xc   :  { %v2218_v17 = vor.u32 %v2965_v15, %v2217_v14  ;;  %v2345_v18 = vld [vmem:[#allocation2 + $0x2c0] sm:$0xf]  ;;  %v2997_v19 = vld [vmem:[#allocation2 + $0x2cc] sm:$0xf0]  ;;  %1291 = vmatpush.bf16.msra.mxu3 %v2490_v12 }
   0xd   :  { %v2473_v20 = vld [vmem:[#allocation2 + $0x3c0] sm:$0xf]  ;;  %v2346_v21 = vor.u32 %v2997_v19, %v2345_v18  ;;  %v3029_v22 = vld [vmem:[#allocation2 + $0x3cc] sm:$0xf0]  ;;  %1250 = vmatpush.bf16.msra.mxu0 %v2090_v16 }
   0xe   :  { %v2073_v23 = vld [vmem:[#allocation2 + $0xa0] sm:$0xf]  ;;  %v2929_v24 = vld [vmem:[#allocation2 + $0xac] sm:$0xf0]  ;;  %v2474_v25 = vor.u32 %v3029_v22, %v2473_v20  ;;  %1264 = vmatpush.bf16.msra.mxu1 %v2218_v17 }
   0xf   :  { %v2201_v26 = vld [vmem:[#allocation2 + $0x1a0] sm:$0xf]  ;;  %v2961_v27 = vld [vmem:[#allocation2 + $0x1ac] sm:$0xf0]  ;;  %v2074_v29 = vor.u32 %v2929_v24, %v2073_v23  ;;  %1278 = vmatpush.bf16.msra.mxu2 %v2346_v21 }
  0x10   :  { %v2329_v28 = vld [vmem:[#allocation2 + $0x2a0] sm:$0xf]  ;;  %v2993_v30 = vld [vmem:[#allocation2 + $0x2ac] sm:$0xf0]  ;;  %v2202_v33 = vor.u32 %v2961_v27, %v2201_v26  ;;  %1292 = vmatpush.bf16.msra.mxu3 %v2474_v25 }
  0x11   :  { %v2457_v31 = vld [vmem:[#allocation2 + $0x3a0] sm:$0xf]  ;;  %v3025_v32 = vld [vmem:[#allocation2 + $0x3ac] sm:$0xf0]  ;;  %v2330_v34 = vor.u32 %v2993_v30, %v2329_v28  ;;  %1251 = vmatpush.bf16.msra.mxu0 %v2074_v29 }
  0x12   :  { %v2057_v35 = vld [vmem:[#allocation2 + $0x80] sm:$0xf]  ;;  %v2925_v36 = vld [vmem:[#allocation2 + $0x8c] sm:$0xf0]  ;;  %v2458_v38 = vor.u32 %v3025_v32, %v2457_v31  ;;  %1265 = vmatpush.bf16.msra.mxu1 %v2202_v33  ;;  %v2935_v32 = vld [vmem:[#allocation2 + $0xe4] sm:$0xf] }
  0x13   :  { %v2185_v37 = vld [vmem:[#allocation2 + $0x180] sm:$0xf]  ;;  %v2957_v39 = vld [vmem:[#allocation2 + $0x18c] sm:$0xf0]  ;;  %v2058_v44 = vor.u32 %v2925_v36, %v2057_v35  ;;  %1279 = vmatpush.bf16.msra.mxu2 %v2330_v34  ;;  %v2107_v33 = vld [vmem:[#allocation2 + $0xf0] sm:$0xf0] }
  0x14   :  { %v2313_v40 = vld [vmem:[#allocation2 + $0x280] sm:$0xf]  ;;  %v2989_v41 = vld [vmem:[#allocation2 + $0x28c] sm:$0xf0]  ;;  %v2186_v45 = vor.u32 %v2957_v39, %v2185_v37  ;;  %1293 = vmatpush.bf16.msra.mxu3 %v2458_v38  ;;  %v47_v36 = vld [vmem:[%s3432_s0 + $0x48] sm:$0xff] }
  0x15   :  { %v2441_v42 = vld [vmem:[#allocation2 + $0x380] sm:$0xf]  ;;  %v3021_v43 = vld [vmem:[#allocation2 + $0x38c] sm:$0xf0]  ;;  %v2314_v46 = vor.u32 %v2989_v41, %v2313_v40  ;;  %1252 = vmatpush.bf16.msra.mxu0 %v2058_v44  ;;  %v2967_v41 = vld [vmem:[#allocation2 + $0x1e4] sm:$0xf] }
  0x16   :  { %v2041_v47 = vld [vmem:[#allocation2 + $0x60] sm:$0xf]  ;;  %v2921_v48 = vld [vmem:[#allocation2 + $0x6c] sm:$0xf0]  ;;  %v2442_v50 = vor.u32 %v3021_v43, %v2441_v42  ;;  %1266 = vmatpush.bf16.msra.mxu1 %v2186_v45  ;;  %v45_v43 = vld [vmem:[%s3432_s0 + $0x38] sm:$0xff] }
  0x17   :  { %v2169_v49 = vld [vmem:[#allocation2 + $0x160] sm:$0xf]  ;;  %v2953_v51 = vld [vmem:[#allocation2 + $0x16c] sm:$0xf0]  ;;  %v2042_v56 = vor.u32 %v2921_v48, %v2041_v47  ;;  %1280 = vmatpush.bf16.msra.mxu2 %v2314_v46  ;;  %v2235_v46 = vld [vmem:[#allocation2 + $0x1f0] sm:$0xf0] }
  0x18   :  { %v2297_v52 = vld [vmem:[#allocation2 + $0x260] sm:$0xf]  ;;  %v2985_v53 = vld [vmem:[#allocation2 + $0x26c] sm:$0xf0]  ;;  %v2170_v57 = vor.u32 %v2953_v51, %v2169_v49  ;;  %1294 = vmatpush.bf16.msra.mxu3 %v2442_v50  ;;  %v41_v47 = vld [vmem:[%s3432_s0 + $0x18] sm:$0xff]  ;;  %v2110_v50 = vor.u32 %v2935_v32, %v2107_v33 }
  0x19   :  { %v2425_v54 = vld [vmem:[#allocation2 + $0x360] sm:$0xf]  ;;  %v3017_v55 = vld [vmem:[#allocation2 + $0x36c] sm:$0xf0]  ;;  %v2298_v58 = vor.u32 %v2985_v53, %v2297_v52  ;;  %1253 = vmatpush.bf16.msra.mxu0 %v2042_v56 }
  0x1a   :  { %v2025_v59 = vld [vmem:[#allocation2 + $0x40] sm:$0xf]  ;;  %v2917_v60 = vld [vmem:[#allocation2 + $0x4c] sm:$0xf0]  ;;  %v2426_v62 = vor.u32 %v3017_v55, %v2425_v54  ;;  %1267 = vmatpush.bf16.msra.mxu1 %v2170_v57  ;;  %v2931_v57 = vld [vmem:[#allocation2 + $0xc4] sm:$0xf] }
  0x1b   :  { %v2153_v61 = vld [vmem:[#allocation2 + $0x140] sm:$0xf]  ;;  %v2949_v63 = vld [vmem:[#allocation2 + $0x14c] sm:$0xf0]  ;;  %v2026_v4 = vor.u32 %v2917_v60, %v2025_v59  ;;  %1281 = vmatpush.bf16.msra.mxu2 %v2298_v58  ;;  %v2091_v58 = vld [vmem:[#allocation2 + $0xd0] sm:$0xf0] }
  0x1c   :  { %v2281_v0 = vld [vmem:[#allocation2 + $0x240] sm:$0xf]  ;;  %v2981_v1 = vld [vmem:[#allocation2 + $0x24c] sm:$0xf0]  ;;  %v2154_v6 = vor.u32 %v2949_v63, %v2153_v61  ;;  %1295 = vmatpush.bf16.msra.mxu3 %v2426_v62  ;;  %v39_v61 = vld [vmem:[%s3432_s0 + $0x8] sm:$0xff]  ;;  %v2238_v63 = vor.u32 %v2967_v41, %v2235_v46 }
  0x1d   :  { %v2409_v2 = vld [vmem:[#allocation2 + $0x340] sm:$0xf]  ;;  %v3013_v3 = vld [vmem:[#allocation2 + $0x34c] sm:$0xf0]  ;;  %v2282_v7 = vor.u32 %v2981_v1, %v2281_v0  ;;  %1254 = vmatpush.bf16.msra.mxu0 %v2026_v4  ;;  %v2963_v1 = vld [vmem:[#allocation2 + $0x1c4] sm:$0xf]  ;;  %v2094_v4 = vor.u32 %v2931_v57, %v2091_v58 }
  0x1e   :  { %v2009_v5 = vld [vmem:[#allocation2 + $0x20] sm:$0xf]  ;;  %v2913_v8 = vld [vmem:[#allocation2 + $0x2c] sm:$0xf0]  ;;  %v2410_v11 = vor.u32 %v3013_v3, %v2409_v2  ;;  %1268 = vmatpush.bf16.msra.mxu1 %v2154_v6  ;;  %v2219_v2 = vld [vmem:[#allocation2 + $0x1d0] sm:$0xf0] }
  0x1f   :  { %v2137_v9 = vld [vmem:[#allocation2 + $0x120] sm:$0xf]  ;;  %v2945_v10 = vld [vmem:[#allocation2 + $0x12c] sm:$0xf0]  ;;  %v2010_v18 = vor.u32 %v2913_v8, %v2009_v5  ;;  %1282 = vmatpush.bf16.msra.mxu2 %v2282_v7  ;;  %v2171_v41 = vld [vmem:[#allocation2 + $0x170] sm:$0xf0] }
  0x20   :  { %v2265_v12 = vld [vmem:[#allocation2 + $0x220] sm:$0xf]  ;;  %v2977_v13 = vld [vmem:[#allocation2 + $0x22c] sm:$0xf0]  ;;  %v2138_v23 = vor.u32 %v2945_v10, %v2137_v9  ;;  %1296 = vmatpush.bf16.msra.mxu3 %v2410_v11  ;;  %v2927_v10 = vld [vmem:[#allocation2 + $0xa4] sm:$0xf] }
  0x21   :  { %v2393_v14 = vld [vmem:[#allocation2 + $0x320] sm:$0xf]  ;;  %v3009_v15 = vld [vmem:[#allocation2 + $0x32c] sm:$0xf0]  ;;  %v2266_v24 = vor.u32 %v2977_v13, %v2265_v12  ;;  %1255 = vmatpush.bf16.msra.mxu0 %v2010_v18  ;;  %v2075_v11 = vld [vmem:[#allocation2 + $0xb0] sm:$0xf0]  ;;  %v2222_v12 = vor.u32 %v2963_v1, %v2219_v2 }
  0x22   :  { %v1993_v16 = vld [vmem:[#allocation2] sm:$0xf]  ;;  %v2909_v17 = vld [vmem:[#allocation2 + $0xc] sm:$0xf0]  ;;  %v2394_v28 = vor.u32 %v3009_v15, %v2393_v14  ;;  %1269 = vmatpush.bf16.msra.mxu1 %v2138_v23  ;;  %v2959_v14 = vld [vmem:[#allocation2 + $0x1a4] sm:$0xf] }
  0x23   :  { %v2121_v19 = vld [vmem:[#allocation2 + $0x100] sm:$0xf]  ;;  %v2941_v20 = vld [vmem:[#allocation2 + $0x10c] sm:$0xf0]  ;;  %v1994_v35 = vor.u32 %v2909_v17, %v1993_v16  ;;  %1283 = vmatpush.bf16.msra.mxu2 %v2266_v24  ;;  %v2203_v15 = vld [vmem:[#allocation2 + $0x1b0] sm:$0xf0]  ;;  %v2078_v17 = vor.u32 %v2927_v10, %v2075_v11 }
  0x24   :  { %v2249_v21 = vld [vmem:[#allocation2 + $0x200] sm:$0xf]  ;;  %v2973_v22 = vld [vmem:[#allocation2 + $0x20c] sm:$0xf0]  ;;  %v2122_v39 = vor.u32 %v2941_v20, %v2121_v19  ;;  %1297 = vmatpush.bf16.msra.mxu3 %v2394_v28  ;;  %v2059_v23 = vld [vmem:[#allocation2 + $0x90] sm:$0xf0]  ;;  %v2206_v24 = vor.u32 %v2959_v14, %v2203_v15 }
  0x25   :  { %v2377_v25 = vld [vmem:[#allocation2 + $0x300] sm:$0xf]  ;;  %v3005_v26 = vld [vmem:[#allocation2 + $0x30c] sm:$0xf0]  ;;  %v2250_v40 = vor.u32 %v2973_v22, %v2249_v21  ;;  %1256 = vmatpush.bf16.msra.mxu0 %v1994_v35  ;;  %v2923_v22 = vld [vmem:[#allocation2 + $0x84] sm:$0xf] }
  0x26   :  { %v2617_v27 = vld [vmem:[#allocation2 + $0x4e0] sm:$0xf]  ;;  %v3065_v29 = vld [vmem:[#allocation2 + $0x4ec] sm:$0xf0]  ;;  %v2378_v44 = vor.u32 %v3005_v26, %v2377_v25  ;;  %1270 = vmatpush.bf16.msra.mxu1 %v2122_v39  ;;  %v2955_v26 = vld [vmem:[#allocation2 + $0x184] sm:$0xf] }
  0x27   :  { %v2745_v30 = vld [vmem:[#allocation2 + $0x5e0] sm:$0xf]  ;;  %v3097_v31 = vld [vmem:[#allocation2 + $0x5ec] sm:$0xf0]  ;;  %v2618_v45 = vor.u32 %v3065_v29, %v2617_v27  ;;  %1284 = vmatpush.bf16.msra.mxu2 %v2250_v40  ;;  %v2187_v27 = vld [vmem:[#allocation2 + $0x190] sm:$0xf0]  ;;  %v2062_v29 = vor.u32 %v2923_v22, %v2059_v23 }
  0x28   :  { %v40_v34 = vld [vmem:[%s3432_s0 + $0x10] sm:$0xff]  ;;  %v2761_v37 = vld [vmem:[#allocation2 + $0x600] sm:$0xf]  ;;  %v2746_v49 = vor.u32 %v3097_v31, %v2745_v30  ;;  %1298 = vmatpush.bf16.msra.mxu3 %v2378_v44  ;;  %v2951_v40 = vld [vmem:[#allocation2 + $0x164] sm:$0xf] }
  0x29   :  { %v3101_v38 = vld [vmem:[#allocation2 + $0x60c] sm:$0xf0]  ;;  %v38_v42 = vld [vmem:[%s3432_s0] sm:$0xff]  ;;  %v3251_v54 = vpack.c.bf16 %v47_v36, %v40_v34  ;;  %1305 = vmatpush.bf16.msrb.mxu0 %v2618_v45  ;;  %v2043_v35 = vld [vmem:[#allocation2 + $0x70] sm:$0xf0] }
  0x2a   :  { %v48_v48 = vld [vmem:[%s3432_s0 + $0x50] sm:$0xff]  ;;  %v2601_v51 = vld [vmem:[#allocation2 + $0x4c0] sm:$0xf]  ;;  %v3253_v55 = vpack.c.bf16 %v45_v43, %v38_v42  ;;  %v2762_v59 = vor.u32 %v3101_v38, %v2761_v37  ;;  %1319 = vmatpush.bf16.msrb.mxu1 %v2746_v49  ;;  %v2919_v34 = vld [vmem:[#allocation2 + $0x64] sm:$0xf]  ;;  %v2190_v38 = vor.u32 %v2955_v26, %v2187_v27 }
  0x2b   :  { %v3061_v52 = vld [vmem:[#allocation2 + $0x4cc] sm:$0xf0]  ;;  %v2729_v53 = vld [vmem:[#allocation2 + $0x5c0] sm:$0xf]  ;;  %v3255_v60 = vpack.c.bf16 %v48_v48, %v41_v47  ;;  %1285 = vmatmul.bf16.vlgmr.msra.gmra.mxu2 %v3251_v54  ;;  %v51_v37 = vld [vmem:[%s3432_s0 + $0x68] sm:$0xff]  ;;  %v2046_v43 = vor.u32 %v2919_v34, %v2043_v35 }
  0x2c   :  { %v3093_v56 = vld [vmem:[#allocation2 + $0x5cc] sm:$0xf0]  ;;  %v46_v62 = vld [vmem:[%s3432_s0 + $0x40] sm:$0xff]  ;;  %v2602_v0 = vor.u32 %v3061_v52, %v2601_v51  ;;  %1347 = vmatpush.bf16.msrb.mxu3 %v2110_v50  ;;  %1257 = vmatmul.bf16.vlgmr.msra.gmra.mxu0 %v3253_v55  ;;  %v2027_v49 = vld [vmem:[#allocation2 + $0x50] sm:$0xf0]  ;;  %v2174_v51 = vor.u32 %v2951_v40, %v2171_v41 }
  0x2d   :  { %v2730_v3 = vor.u32 %v3093_v56, %v2729_v53  ;;  %v2585_v5 = vld [vmem:[#allocation2 + $0x4a0] sm:$0xf]  ;;  %v3057_v6 = vld [vmem:[#allocation2 + $0x4ac] sm:$0xf0]  ;;  %v3265_v8 = vpack.c.bf16 %v46_v62, %v39_v61  ;;  %1340 = vmatpush.bf16.msrb.mxu2 %v2762_v59  ;;  %1299 = vmatmul.bf16.vlgmr.msra.gmra.mxu3 %v3255_v60  ;;  %v2915_v48 = vld [vmem:[#allocation2 + $0x44] sm:$0xf] }
  0x2e   :  { %v2713_v7 = vld [vmem:[#allocation2 + $0x5a0] sm:$0xf]  ;;  %v3089_v9 = vld [vmem:[#allocation2 + $0x5ac] sm:$0xf0]  ;;  %1306 = vmatpush.bf16.msrb.mxu0 %v2602_v0  ;;  %v2586_v13 = vor.u32 %v3057_v6, %v2585_v5  ;;  %v2947_v53 = vld [vmem:[#allocation2 + $0x144] sm:$0xf]  ;;  %v2030_v58 = vor.u32 %v2915_v48, %v2027_v49 }
  0x2f   :  { %1320 = vmatpush.bf16.msrb.mxu1 %v2730_v3  ;;  %v2714_v16 = vor.u32 %v3089_v9, %v2713_v7  ;;  %v2569_v18 = vld [vmem:[#allocation2 + $0x480] sm:$0xf]  ;;  %v3053_v19 = vld [vmem:[#allocation2 + $0x48c] sm:$0xf0]  ;;  %v2155_v56 = vld [vmem:[#allocation2 + $0x150] sm:$0xf0] }
  0x30   :  { %1348 = vmatpush.bf16.msrb.mxu3 %v2094_v4  ;;  %v2697_v20 = vld [vmem:[#allocation2 + $0x580] sm:$0xf]  ;;  %1271 = vmatmul.bf16.vlgmr.msra.gmra.mxu1 %v3265_v8  ;;  %v3085_v21 = vld [vmem:[#allocation2 + $0x58c] sm:$0xf0]  ;;  %v2570_v25 = vor.u32 %v3053_v19, %v2569_v18  ;;  %v2911_v0 = vld [vmem:[#allocation2 + $0x24] sm:$0xf]  ;;  %v2158_v4 = vor.u32 %v2947_v53, %v2155_v56 }
  0x31   :  { %1361 = vmatpush.bf16.msra.mxu2 %v2238_v63  ;;  %v2698_v28 = vor.u32 %v3085_v21, %v2697_v20  ;;  %v2553_v30 = vld [vmem:[#allocation2 + $0x460] sm:$0xf]  ;;  %v3049_v31 = vld [vmem:[#allocation2 + $0x46c] sm:$0xf0]  ;;  %v2011_v1 = vld [vmem:[#allocation2 + $0x30] sm:$0xf0] }
  0x32   :  { %1307 = vmatpush.bf16.msrb.mxu0 %v2586_v13  ;;  %v2681_v32 = vld [vmem:[#allocation2 + $0x560] sm:$0xf]  ;;  %v3081_v33 = vld [vmem:[#allocation2 + $0x56c] sm:$0xf0]  ;;  %v2554_v39 = vor.u32 %v3049_v31, %v2553_v30  ;;  %v2943_v2 = vld [vmem:[#allocation2 + $0x124] sm:$0xf]  ;;  %v2014_v11 = vor.u32 %v2911_v0, %v2011_v1 }
  0x33   :  { %1321 = vmatpush.bf16.msrb.mxu1 %v2714_v16  ;;  %v44_v36 = vld [vmem:[%s3432_s0 + $0x30] sm:$0xff]  ;;  %v2682_v42 = vor.u32 %v3081_v33, %v2681_v32  ;;  %v2537_v44 = vld [vmem:[#allocation2 + $0x440] sm:$0xf]  ;;  %v2907_v13 = vld [vmem:[#allocation2 + $0x4] sm:$0xf] }
  0x34   :  { %1349 = vmatpush.bf16.msrb.mxu3 %v2078_v17  ;;  %v3045_v45 = vld [vmem:[#allocation2 + $0x44c] sm:$0xf0]  ;;  %v2665_v46 = vld [vmem:[#allocation2 + $0x540] sm:$0xf]  ;;  %v3275_v50 = vpack.c.bf16 %v51_v37, %v44_v36  ;;  %v2139_v3 = vld [vmem:[#allocation2 + $0x130] sm:$0xf0] }
  0x35   :  { %1362 = vmatpush.bf16.msra.mxu2 %v2222_v12  ;;  %v3077_v47 = vld [vmem:[#allocation2 + $0x54c] sm:$0xf0]  ;;  %v2538_v52 = vor.u32 %v3045_v45, %v2537_v44  ;;  %v2521_v59 = vld [vmem:[#allocation2 + $0x420] sm:$0xf]  ;;  %v1995_v14 = vld [vmem:[#allocation2 + $0x10] sm:$0xf0]  ;;  %v2142_v21 = vor.u32 %v2943_v2, %v2139_v3 }
  0x36   :  { %1308 = vmatpush.bf16.msrb.mxu0 %v2570_v25  ;;  %v2666_v57 = vor.u32 %v3077_v47, %v2665_v46  ;;  %v3041_v61 = vld [vmem:[#allocation2 + $0x42c] sm:$0xf0]  ;;  %v2649_v62 = vld [vmem:[#allocation2 + $0x520] sm:$0xf]  ;;  %v2999_v15 = vld [vmem:[#allocation2 + $0x2e4] sm:$0xf]  ;;  %v1998_v27 = vor.u32 %v2907_v13, %v1995_v14 }
  0x37   :  { %1322 = vmatpush.bf16.msrb.mxu1 %v2698_v28  ;;  %v3073_v63 = vld [vmem:[#allocation2 + $0x52c] sm:$0xf0]  ;;  %v2522_v5 = vor.u32 %v3041_v61, %v2521_v59  ;;  %v2505_v6 = vld [vmem:[#allocation2 + $0x400] sm:$0xf]  ;;  %v2363_v16 = vld [vmem:[#allocation2 + $0x2f0] sm:$0xf0] }
  0x38   :  { %1350 = vmatpush.bf16.msrb.mxu3 %v2062_v29  ;;  %v3037_v7 = vld [vmem:[#allocation2 + $0x40c] sm:$0xf0]  ;;  %v2633_v9 = vld [vmem:[#allocation2 + $0x500] sm:$0xf]  ;;  %v2650_v10 = vor.u32 %v3073_v63, %v2649_v62  ;;  %v3031_v17 = vld [vmem:[#allocation2 + $0x3e4] sm:$0xf]  ;;  %v2366_v31 = vor.u32 %v2999_v15, %v2363_v16 }
  0x39   :  { %1363 = vmatpush.bf16.msra.mxu2 %v2206_v24  ;;  %v3069_v12 = vld [vmem:[#allocation2 + $0x50c] sm:$0xf0]  ;;  %v2491_v18 = vld [vmem:[#allocation2 + $0x3f0] sm:$0xf0]  ;;  %v3063_v19 = vld [vmem:[#allocation2 + $0x4e4] sm:$0xf]  ;;  %v2506_v22 = vor.u32 %v3037_v7, %v2505_v6 }
  0x3a   :  { %1309 = vmatpush.bf16.msrb.mxu0 %v2554_v39  ;;  %v2619_v20 = vld [vmem:[#allocation2 + $0x4f0] sm:$0xf0]  ;;  %v42_v23 = vld [vmem:[%s3432_s0 + $0x20] sm:$0xff]  ;;  %v49_v24 = vld [vmem:[%s3432_s0 + $0x58] sm:$0xff]  ;;  %v2634_v26 = vor.u32 %v3069_v12, %v2633_v9  ;;  %v2494_v32 = vor.u32 %v3031_v17, %v2491_v18 }
  0x3b   :  { %1323 = vmatpush.bf16.msrb.mxu1 %v2682_v42  ;;  %2775 = vmatmul.msk.bf16.vlgmr.msrb.gmra.mxu2 %vm1245_vm0, %v3275_v50  ;;  %v2939_v25 = vld [vmem:[#allocation2 + $0x104] sm:$0xf]  ;;  %v2123_v28 = vld [vmem:[#allocation2 + $0x110] sm:$0xf0]  ;;  %v43_v29 = vld [vmem:[%s3432_s0 + $0x28] sm:$0xff]  ;;  %v2622_v36 = vor.u32 %v3063_v19, %v2619_v20  ;;  %v3291_v37 = vpack.c.bf16 %v49_v24, %v42_v23 }
  0x3c   :  { %1351 = vmatpush.bf16.msrb.mxu3 %v2046_v43  ;;  %v50_v30 = vld [vmem:[%s3432_s0 + $0x60] sm:$0xff]  ;;  %v2747_v34 = vld [vmem:[#allocation2 + $0x5f0] sm:$0xf0]  ;;  %v2126_v41 = vor.u32 %v2939_v25, %v2123_v28 }
  0x3d   :  { %1364 = vmatpush.bf16.msra.mxu2 %v2190_v38  ;;  %v3095_v33 = vld [vmem:[#allocation2 + $0x5e4] sm:$0xf]  ;;  %v2347_v38 = vld [vmem:[#allocation2 + $0x2d0] sm:$0xf0]  ;;  %v3293_v42 = vpack.c.bf16 %v50_v30, %v43_v29 }
  0x3e   :  { %1310 = vmatpush.bf16.msrb.mxu0 %v2538_v52  ;;  %v2995_v35 = vld [vmem:[#allocation2 + $0x2c4] sm:$0xf]  ;;  %v2475_v40 = vld [vmem:[#allocation2 + $0x3d0] sm:$0xf0]  ;;  %v2750_v45 = vor.u32 %v3095_v33, %v2747_v34 }
  0x3f   :  { %1324 = vmatpush.bf16.msrb.mxu1 %v2666_v57  ;;  %v3027_v39 = vld [vmem:[#allocation2 + $0x3c4] sm:$0xf]  ;;  %v2603_v44 = vld [vmem:[#allocation2 + $0x4d0] sm:$0xf0]  ;;  %v2350_v46 = vor.u32 %v2995_v35, %v2347_v38 }
  0x40   :  { %1352 = vmatpush.bf16.msrb.mxu3 %v2030_v58  ;;  %v3059_v43 = vld [vmem:[#allocation2 + $0x4c4] sm:$0xf]  ;;  %v2478_v47 = vor.u32 %v3027_v39, %v2475_v40  ;;  %v2731_v49 = vld [vmem:[#allocation2 + $0x5d0] sm:$0xf0] }
  0x41   :  { %1365 = vmatpush.bf16.msra.mxu2 %v2174_v51  ;;  %v3091_v48 = vld [vmem:[#allocation2 + $0x5c4] sm:$0xf]  ;;  %v2606_v52 = vor.u32 %v3059_v43, %v2603_v44  ;;  %v2331_v53 = vld [vmem:[#allocation2 + $0x2b0] sm:$0xf0] }
  0x42   :  { %1311 = vmatpush.bf16.msrb.mxu0 %v2522_v5  ;;  %v2991_v51 = vld [vmem:[#allocation2 + $0x2a4] sm:$0xf]  ;;  %v2459_v57 = vld [vmem:[#allocation2 + $0x3b0] sm:$0xf0]  ;;  %v2734_v61 = vor.u32 %v3091_v48, %v2731_v49 }
  0x43   :  { %1325 = vmatpush.bf16.msrb.mxu1 %v2650_v10  ;;  %v3023_v56 = vld [vmem:[#allocation2 + $0x3a4] sm:$0xf]  ;;  %v2587_v59 = vld [vmem:[#allocation2 + $0x4b0] sm:$0xf0]  ;;  %v2334_v62 = vor.u32 %v2991_v51, %v2331_v53 }
  0x44   :  { %1353 = vmatpush.bf16.msrb.mxu3 %v2014_v11  ;;  %v3055_v58 = vld [vmem:[#allocation2 + $0x4a4] sm:$0xf]  ;;  %v2462_v63 = vor.u32 %v3023_v56, %v2459_v57  ;;  %v2715_v1 = vld [vmem:[#allocation2 + $0x5b0] sm:$0xf0] }
  0x45   :  { %1366 = vmatpush.bf16.msra.mxu2 %v2158_v4  ;;  %v3087_v0 = vld [vmem:[#allocation2 + $0x5a4] sm:$0xf]  ;;  %v2590_v3 = vor.u32 %v3055_v58, %v2587_v59  ;;  %v2315_v4 = vld [vmem:[#allocation2 + $0x290] sm:$0xf0] }
  0x46   :  { %1312 = vmatpush.bf16.msrb.mxu0 %v2506_v22  ;;  %v2987_v2 = vld [vmem:[#allocation2 + $0x284] sm:$0xf]  ;;  %v2443_v6 = vld [vmem:[#allocation2 + $0x390] sm:$0xf0]  ;;  %v2718_v10 = vor.u32 %v3087_v0, %v2715_v1  ;;  %v2113_v0 = vld [vmem:[#allocation2 + $0xe8] sm:$0xf] }
  0x47   :  { %1326 = vmatpush.bf16.msrb.mxu1 %v2634_v26  ;;  %v3019_v5 = vld [vmem:[#allocation2 + $0x384] sm:$0xf]  ;;  %v2571_v9 = vld [vmem:[#allocation2 + $0x490] sm:$0xf0]  ;;  %v2318_v11 = vor.u32 %v2987_v2, %v2315_v4  ;;  %v2938_v1 = vld [vmem:[#allocation2 + $0xf4] sm:$0xf0] }
  0x48   :  { %1354 = vmatpush.bf16.msrb.mxu3 %v1998_v27  ;;  %v3051_v7 = vld [vmem:[#allocation2 + $0x484] sm:$0xf]  ;;  %v2446_v12 = vor.u32 %v3019_v5, %v2443_v6  ;;  %v2699_v14 = vld [vmem:[#allocation2 + $0x590] sm:$0xf0]  ;;  %v2369_v5 = vld [vmem:[#allocation2 + $0x2e8] sm:$0xf] }
  0x49   :  { %1367 = vmatpush.bf16.msra.mxu2 %v2142_v21  ;;  %1313 = vmatmul.bf16.vlgmr.msrb.gmra.mxu0 %v3291_v37  ;;  %v3083_v13 = vld [vmem:[#allocation2 + $0x584] sm:$0xf]  ;;  %v2574_v16 = vor.u32 %v3051_v7, %v2571_v9  ;;  %v2299_v17 = vld [vmem:[#allocation2 + $0x270] sm:$0xf0]  ;;  %v3002_v6 = vld [vmem:[#allocation2 + $0x2f4] sm:$0xf0] }
  0x4a   :  { %1375 = vmatpush.bf16.msra.mxu0 %v2366_v31  ;;  %1327 = vmatmul.bf16.vlgmr.msrb.gmra.mxu1 %v3293_v42  ;;  %v2983_v15 = vld [vmem:[#allocation2 + $0x264] sm:$0xf]  ;;  %v2427_v19 = vld [vmem:[#allocation2 + $0x370] sm:$0xf0]  ;;  %v2702_v22 = vor.u32 %v3083_v13, %v2699_v14  ;;  %v2114_v13 = vor.u32 %v2938_v1, %v2113_v0  ;;  %v2497_v14 = vld [vmem:[#allocation2 + $0x3e8] sm:$0xf] }
  0x4b   :  { %1389 = vmatpush.bf16.msra.mxu1 %v2494_v32  ;;  %1355 = vmatmul.bf16.vlgmr.msrb.gmra.mxu3 %v3253_v55  ;;  %v3015_v18 = vld [vmem:[#allocation2 + $0x364] sm:$0xf]  ;;  %v2555_v21 = vld [vmem:[#allocation2 + $0x470] sm:$0xf0]  ;;  %v2302_v23 = vor.u32 %v2983_v15, %v2299_v17  ;;  %v3034_v15 = vld [vmem:[#allocation2 + $0x3f4] sm:$0xf0] }
  0x4c   :  { %1403 = vmatpush.bf16.msra.mxu3 %v2622_v36  ;;  %v3047_v20 = vld [vmem:[#allocation2 + $0x464] sm:$0xf]  ;;  %v2430_v24 = vor.u32 %v3015_v18, %v2427_v19  ;;  %v2683_v26 = vld [vmem:[#allocation2 + $0x570] sm:$0xf0]  ;;  %v2241_v17 = vld [vmem:[#allocation2 + $0x1e8] sm:$0xf]  ;;  %v2370_v19 = vor.u32 %v3002_v6, %v2369_v5 }
  0x4d   :  { %1368 = vmatpush.bf16.msra.mxu2 %v2126_v41  ;;  %v3079_v25 = vld [vmem:[#allocation2 + $0x564] sm:$0xf]  ;;  %v2558_v28 = vor.u32 %v3047_v20, %v2555_v21  ;;  %v2283_v29 = vld [vmem:[#allocation2 + $0x250] sm:$0xf0]  ;;  %v2970_v18 = vld [vmem:[#allocation2 + $0x1f4] sm:$0xf0] }
  0x4e   :  { %1376 = vmatpush.bf16.msra.mxu0 %v2350_v46  ;;  %v2979_v27 = vld [vmem:[#allocation2 + $0x244] sm:$0xf]  ;;  %v2411_v31 = vld [vmem:[#allocation2 + $0x350] sm:$0xf0]  ;;  %v2686_v34 = vor.u32 %v3079_v25, %v2683_v26  ;;  %v2097_v21 = vld [vmem:[#allocation2 + $0xc8] sm:$0xf]  ;;  %v2242_v26 = vor.u32 %v2970_v18, %v2241_v17 }
  0x4f   :  { %1390 = vmatpush.bf16.msra.mxu1 %v2478_v47  ;;  %v3011_v30 = vld [vmem:[#allocation2 + $0x344] sm:$0xf]  ;;  %v2539_v33 = vld [vmem:[#allocation2 + $0x450] sm:$0xf0]  ;;  %v2286_v35 = vor.u32 %v2979_v27, %v2283_v29  ;;  %v2998_v25 = vld [vmem:[#allocation2 + $0x2d4] sm:$0xf0] }
  0x50   :  { %1404 = vmatpush.bf16.msra.mxu3 %v2606_v52  ;;  %1369 = vmatmul.bf16.vlgmr.msra.gmra.mxu2 %v3265_v8  ;;  %v3043_v32 = vld [vmem:[#allocation2 + $0x444] sm:$0xf]  ;;  %v2414_v36 = vor.u32 %v3011_v30, %v2411_v31  ;;  %v2667_v39 = vld [vmem:[#allocation2 + $0x550] sm:$0xf0]  ;;  %v2481_v27 = vld [vmem:[#allocation2 + $0x3c8] sm:$0xf] }
  0x51   :  { %1417 = vmatpush.bf16.msrb.mxu2 %v2750_v45  ;;  %v3075_v38 = vld [vmem:[#allocation2 + $0x544] sm:$0xf]  ;;  %v2542_v41 = vor.u32 %v3043_v32, %v2539_v33  ;;  %v2267_v43 = vld [vmem:[#allocation2 + $0x230] sm:$0xf0]  ;;  %v2225_v30 = vld [vmem:[#allocation2 + $0x1c8] sm:$0xf] }
  0x52   :  { %1377 = vmatpush.bf16.msra.mxu0 %v2334_v62  ;;  %v2975_v40 = vld [vmem:[#allocation2 + $0x224] sm:$0xf]  ;;  %v2395_v45 = vld [vmem:[#allocation2 + $0x330] sm:$0xf0]  ;;  %v2670_v48 = vor.u32 %v3075_v38, %v2667_v39  ;;  %v2966_v31 = vld [vmem:[#allocation2 + $0x1d4] sm:$0xf0] }
  0x53   :  { %1391 = vmatpush.bf16.msra.mxu1 %v2462_v63  ;;  %v3007_v44 = vld [vmem:[#allocation2 + $0x324] sm:$0xf]  ;;  %v2523_v47 = vld [vmem:[#allocation2 + $0x430] sm:$0xf0]  ;;  %v2270_v52 = vor.u32 %v2975_v40, %v2267_v43  ;;  %v2081_v33 = vld [vmem:[#allocation2 + $0xa8] sm:$0xf]  ;;  %v2226_v39 = vor.u32 %v2966_v31, %v2225_v30 }
  0x54   :  { %1405 = vmatpush.bf16.msra.mxu3 %v2590_v3  ;;  %v3039_v46 = vld [vmem:[#allocation2 + $0x424] sm:$0xf]  ;;  %v2651_v51 = vld [vmem:[#allocation2 + $0x530] sm:$0xf0]  ;;  %v2398_v53 = vor.u32 %v3007_v44, %v2395_v45  ;;  %v2994_v38 = vld [vmem:[#allocation2 + $0x2b4] sm:$0xf0] }
  0x55   :  { %1418 = vmatpush.bf16.msrb.mxu2 %v2734_v61  ;;  %v3071_v49 = vld [vmem:[#allocation2 + $0x524] sm:$0xf]  ;;  %v2251_v57 = vld [vmem:[#allocation2 + $0x210] sm:$0xf0]  ;;  %v2526_v59 = vor.u32 %v3039_v46, %v2523_v47  ;;  %v2465_v40 = vld [vmem:[#allocation2 + $0x3a8] sm:$0xf] }
  0x56   :  { %1378 = vmatpush.bf16.msra.mxu0 %v2318_v11  ;;  %v2971_v56 = vld [vmem:[#allocation2 + $0x204] sm:$0xf]  ;;  %v2379_v61 = vld [vmem:[#allocation2 + $0x310] sm:$0xf0]  ;;  %v2654_v3 = vor.u32 %v3071_v49, %v2651_v51  ;;  %v2209_v44 = vld [vmem:[#allocation2 + $0x1a8] sm:$0xf] }
  0x57   :  { %1392 = vmatpush.bf16.msra.mxu1 %v2446_v12  ;;  %v3003_v58 = vld [vmem:[#allocation2 + $0x304] sm:$0xf]  ;;  %v2507_v63 = vld [vmem:[#allocation2 + $0x410] sm:$0xf0]  ;;  %v2254_v7 = vor.u32 %v2971_v56, %v2251_v57  ;;  %v2962_v45 = vld [vmem:[#allocation2 + $0x1b4] sm:$0xf0] }
  0x58   :  { %1406 = vmatpush.bf16.msra.mxu3 %v2574_v16  ;;  %v3035_v62 = vld [vmem:[#allocation2 + $0x404] sm:$0xf]  ;;  %v2763_v4 = vld [vmem:[#allocation2 + $0x610] sm:$0xf0]  ;;  %v2382_v9 = vor.u32 %v3003_v58, %v2379_v61  ;;  %v2065_v47 = vld [vmem:[#allocation2 + $0x88] sm:$0xf] }
  0x59   :  { %1419 = vmatpush.bf16.msrb.mxu2 %v2718_v10  ;;  %v3099_v2 = vld [vmem:[#allocation2 + $0x604] sm:$0xf]  ;;  %v2635_v11 = vld [vmem:[#allocation2 + $0x510] sm:$0xf0]  ;;  %v2510_v12 = vor.u32 %v3035_v62, %v2507_v63  ;;  %v2321_v51 = vld [vmem:[#allocation2 + $0x288] sm:$0xf] }
  0x5a   :  { %1379 = vmatpush.bf16.msra.mxu0 %v2302_v23  ;;  %v3067_v10 = vld [vmem:[#allocation2 + $0x504] sm:$0xf]  ;;  %v2766_v16 = vor.u32 %v3099_v2, %v2763_v4  ;;  %v2498_v23 = vor.u32 %v3034_v15, %v2497_v14  ;;  %v2449_v56 = vld [vmem:[#allocation2 + $0x388] sm:$0xf]  ;;  %v3022_v57 = vld [vmem:[#allocation2 + $0x394] sm:$0xf0] }
  0x5b   :  { %1393 = vmatpush.bf16.msra.mxu1 %v2430_v24  ;;  %v2638_v20 = vor.u32 %v3067_v10, %v2635_v11  ;;  %v2353_v24 = vld [vmem:[#allocation2 + $0x2c8] sm:$0xf]  ;;  %v2958_v61 = vld [vmem:[#allocation2 + $0x194] sm:$0xf0]  ;;  %v2450_v1 = vor.u32 %v3022_v57, %v2449_v56  ;;  %v2936_v56 = vld [vmem:[#allocation2 + $0xec] sm:$0xf] }
  0x5c   :  { %1407 = vmatpush.bf16.msra.mxu3 %v2558_v28  ;;  %v3030_v28 = vld [vmem:[#allocation2 + $0x3d4] sm:$0xf0]  ;;  %v2354_v32 = vor.u32 %v2998_v25, %v2353_v24  ;;  %v2049_v63 = vld [vmem:[#allocation2 + $0x68] sm:$0xf]  ;;  %v2115_v57 = vld [vmem:[#allocation2 + $0xf8] sm:$0xf0] }
  0x5d   :  { %1420 = vmatpush.bf16.msrb.mxu2 %v2702_v22  ;;  %v2934_v22 = vld [vmem:[#allocation2 + $0xd4] sm:$0xf0]  ;;  %v2305_v2 = vld [vmem:[#allocation2 + $0x268] sm:$0xf] }
  0x5e   :  { %1380 = vmatpush.bf16.msra.mxu0 %v2286_v35  ;;  %v2098_v29 = vor.u32 %v2934_v22, %v2097_v21  ;;  %v2482_v35 = vor.u32 %v3030_v28, %v2481_v27  ;;  %v2922_v0 = vld [vmem:[#allocation2 + $0x74] sm:$0xf0]  ;;  %v2433_v5 = vld [vmem:[#allocation2 + $0x368] sm:$0xf] }
  0x5f   :  { %1394 = vmatpush.bf16.msra.mxu1 %v2414_v36  ;;  %v2337_v36 = vld [vmem:[#allocation2 + $0x2a8] sm:$0xf]  ;;  %v3018_v6 = vld [vmem:[#allocation2 + $0x374] sm:$0xf0] }
  0x60   :  { %1408 = vmatpush.bf16.msra.mxu3 %v2542_v41  ;;  %v3026_v41 = vld [vmem:[#allocation2 + $0x3b4] sm:$0xf0]  ;;  %v2338_v46 = vor.u32 %v2994_v38, %v2337_v36  ;;  %v2434_v14 = vor.u32 %v3018_v6, %v2433_v5  ;;  %v2289_v15 = vld [vmem:[#allocation2 + $0x248] sm:$0xf]  ;;  %v2118_v6 = vor.u32 %v2936_v56, %v2115_v57 }
  0x61   :  { %1421 = vmatpush.bf16.msrb.mxu2 %v2686_v34  ;;  %v2930_v34 = vld [vmem:[#allocation2 + $0xb4] sm:$0xf0]  ;;  %v2466_v49 = vor.u32 %v3026_v41, %v2465_v40  ;;  %v2417_v18 = vld [vmem:[#allocation2 + $0x348] sm:$0xf] }
  0x62   :  { %1381 = vmatpush.bf16.msra.mxu0 %v2270_v52  ;;  %v2082_v43 = vor.u32 %v2930_v34, %v2081_v33  ;;  %v2990_v52 = vld [vmem:[#allocation2 + $0x294] sm:$0xf0]  ;;  %v2161_v21 = vld [vmem:[#allocation2 + $0x148] sm:$0xf] }
  0x63   :  { %1395 = vmatpush.bf16.msra.mxu1 %v2398_v53  ;;  %v2210_v53 = vor.u32 %v2962_v45, %v2209_v44  ;;  %v2322_v62 = vor.u32 %v2990_v52, %v2321_v51  ;;  %v2954_v10 = vld [vmem:[#allocation2 + $0x174] sm:$0xf0]  ;;  %v2017_v24 = vld [vmem:[#allocation2 + $0x28] sm:$0xf] }
  0x64   :  { %1409 = vmatpush.bf16.msra.mxu3 %v2526_v59  ;;  %v2193_v59 = vld [vmem:[#allocation2 + $0x188] sm:$0xf]  ;;  %v2950_v22 = vld [vmem:[#allocation2 + $0x154] sm:$0xf0] }
  0x65   :  { %1422 = vmatpush.bf16.msrb.mxu2 %v2670_v48  ;;  %v2926_v48 = vld [vmem:[#allocation2 + $0x94] sm:$0xf0]  ;;  %v2194_v4 = vor.u32 %v2958_v61, %v2193_v59  ;;  %v2273_v27 = vld [vmem:[#allocation2 + $0x228] sm:$0xf] }
  0x66   :  { %1382 = vmatpush.bf16.msra.mxu0 %v2254_v7  ;;  %v2066_v58 = vor.u32 %v2926_v48, %v2065_v47  ;;  %v2050_v7 = vor.u32 %v2922_v0, %v2049_v63  ;;  %v2914_v25 = vld [vmem:[#allocation2 + $0x34] sm:$0xf0]  ;;  %v2401_v30 = vld [vmem:[#allocation2 + $0x328] sm:$0xf] }
  0x67   :  { %1396 = vmatpush.bf16.msra.mxu1 %v2382_v9  ;;  %v2177_v9 = vld [vmem:[#allocation2 + $0x168] sm:$0xf]  ;;  %v2978_v28 = vld [vmem:[#allocation2 + $0x234] sm:$0xf0] }
  0x68   :  { %1410 = vmatpush.bf16.msra.mxu3 %v2510_v12  ;;  %v2033_v12 = vld [vmem:[#allocation2 + $0x48] sm:$0xf]  ;;  %v2178_v17 = vor.u32 %v2954_v10, %v2177_v9  ;;  %v3010_v31 = vld [vmem:[#allocation2 + $0x334] sm:$0xf0]  ;;  %v2274_v36 = vor.u32 %v2978_v28, %v2273_v27  ;;  %v2932_v9 = vld [vmem:[#allocation2 + $0xcc] sm:$0xf] }
  0x69   :  { %1423 = vmatpush.bf16.msrb.mxu2 %v2654_v3  ;;  %1383 = vmatmul.bf16.vlgmr.msra.gmra.mxu0 %v3251_v54  ;;  %v2986_v3 = vld [vmem:[#allocation2 + $0x274] sm:$0xf0]  ;;  %v2145_v33 = vld [vmem:[#allocation2 + $0x128] sm:$0xf]  ;;  %v2402_v41 = vor.u32 %v3010_v31, %v2401_v30  ;;  %v2099_v10 = vld [vmem:[#allocation2 + $0xd8] sm:$0xf0] }
  0x6a   :  { %1473 = vmatpush.bf16.msrb.mxu0 %v2370_v19  ;;  %1397 = vmatmul.bf16.vlgmr.msra.gmra.mxu1 %v3255_v60  ;;  %v2306_v11 = vor.u32 %v2986_v3, %v2305_v2  ;;  %v3014_v19 = vld [vmem:[#allocation2 + $0x354] sm:$0xf0]  ;;  %v2257_v44 = vld [vmem:[#allocation2 + $0x208] sm:$0xf]  ;;  %v2968_v3 = vld [vmem:[#allocation2 + $0x1ec] sm:$0xf] }
  0x6b   :  { %1445 = vmatpush.bf16.msrb.mxu1 %v2114_v13  ;;  %1411 = vmatmul.bf16.vlgmr.msra.gmra.mxu3 %v3291_v37  ;;  %v2918_v13 = vld [vmem:[#allocation2 + $0x54] sm:$0xf0]  ;;  %v2753_v61 = vld [vmem:[#allocation2 + $0x5e8] sm:$0xf]  ;;  %v2211_v30 = vld [vmem:[#allocation2 + $0x1b8] sm:$0xf0] }
  0x6c   :  { %1438 = vmatpush.bf16.msrb.mxu3 %v2766_v16  ;;  %v2982_v16 = vld [vmem:[#allocation2 + $0x254] sm:$0xf0]  ;;  %v2609_v63 = vld [vmem:[#allocation2 + $0x4c8] sm:$0xf] }
  0x6d   :  { %1424 = vmatpush.bf16.msrb.mxu2 %v2638_v20  ;;  %v2034_v20 = vor.u32 %v2918_v13, %v2033_v12  ;;  %v2946_v34 = vld [vmem:[#allocation2 + $0x134] sm:$0xf0]  ;;  %v2737_v13 = vld [vmem:[#allocation2 + $0x5c8] sm:$0xf] }
  0x6e   :  { %1474 = vmatpush.bf16.msrb.mxu0 %v2354_v32  ;;  %v2018_v32 = vor.u32 %v2914_v25, %v2017_v24  ;;  %v2910_v38 = vld [vmem:[#allocation2 + $0x14] sm:$0xf0]  ;;  %v2146_v47 = vor.u32 %v2946_v34, %v2145_v33  ;;  %v2721_v25 = vld [vmem:[#allocation2 + $0x5a8] sm:$0xf]  ;;  %v2924_v33 = vld [vmem:[#allocation2 + $0x8c] sm:$0xf] }
  0x6f   :  { %1446 = vmatpush.bf16.msrb.mxu1 %v2098_v29  ;;  %v2162_v29 = vor.u32 %v2950_v22, %v2161_v21  ;;  %v3066_v40 = vld [vmem:[#allocation2 + $0x4f4] sm:$0xf0]  ;;  %v2928_v21 = vld [vmem:[#allocation2 + $0xac] sm:$0xf]  ;;  %v2083_v22 = vld [vmem:[#allocation2 + $0xb8] sm:$0xf0] }
  0x70   :  { %1459 = vmatpush.bf16.msra.mxu3 %v2242_v26  ;;  %1425 = vmatmul.bf16.vlgmr.msrb.gmra.mxu2 %v3293_v42  ;;  %v2418_v26 = vor.u32 %v3014_v19, %v2417_v18  ;;  %v2974_v45 = vld [vmem:[#allocation2 + $0x214] sm:$0xf0]  ;;  %v2227_v18 = vld [vmem:[#allocation2 + $0x1d8] sm:$0xf0]  ;;  %v2102_v19 = vor.u32 %v2932_v9, %v2099_v10  ;;  %v2577_v27 = vld [vmem:[#allocation2 + $0x488] sm:$0xf]  ;;  %v2086_v31 = vor.u32 %v2928_v21, %v2083_v22 }
  0x71   :  { %1487 = vmatpush.bf16.msra.mxu2 %v2498_v23  ;;  %v2290_v23 = vor.u32 %v2982_v16, %v2289_v15  ;;  %v3006_v48 = vld [vmem:[#allocation2 + $0x314] sm:$0xf0]  ;;  %v2258_v59 = vor.u32 %v2974_v45, %v2257_v44  ;;  %v2593_v15 = vld [vmem:[#allocation2 + $0x4a8] sm:$0xf]  ;;  %v2067_v34 = vld [vmem:[#allocation2 + $0x98] sm:$0xf0] }
  0x72   :  { %1475 = vmatpush.bf16.msrb.mxu0 %v2338_v46  ;;  %v2385_v46 = vld [vmem:[#allocation2 + $0x308] sm:$0xf]  ;;  %v3102_v51 = vld [vmem:[#allocation2 + $0x614] sm:$0xf0]  ;;  %v2195_v44 = vld [vmem:[#allocation2 + $0x198] sm:$0xf0]  ;;  %v2070_v45 = vor.u32 %v2924_v33, %v2067_v34 }
  0x73   :  { %1447 = vmatpush.bf16.msrb.mxu1 %v2082_v43  ;;  %v2129_v43 = vld [vmem:[#allocation2 + $0x108] sm:$0xf]  ;;  %v2386_v0 = vor.u32 %v3006_v48, %v2385_v46  ;;  %v3058_v16 = vld [vmem:[#allocation2 + $0x4b4] sm:$0xf0]  ;;  %v2051_v48 = vld [vmem:[#allocation2 + $0x78] sm:$0xf0] }
  0x74   :  { %1460 = vmatpush.bf16.msra.mxu3 %v2226_v39  ;;  %v2625_v39 = vld [vmem:[#allocation2 + $0x4e8] sm:$0xf]  ;;  %v3054_v28 = vld [vmem:[#allocation2 + $0x494] sm:$0xf0]  ;;  %v2163_v9 = vld [vmem:[#allocation2 + $0x158] sm:$0xf0] }
  0x75   :  { %1488 = vmatpush.bf16.msra.mxu2 %v2482_v35  ;;  %v2001_v35 = vld [vmem:[#allocation2 + $0x8] sm:$0xf]  ;;  %v3046_v57 = vld [vmem:[#allocation2 + $0x454] sm:$0xf0]  ;;  %v2147_v21 = vld [vmem:[#allocation2 + $0x138] sm:$0xf0] }
  0x76   :  { %1476 = vmatpush.bf16.msrb.mxu0 %v2322_v62  ;;  %v2002_v52 = vor.u32 %v2910_v38, %v2001_v35  ;;  %v3098_v62 = vld [vmem:[#allocation2 + $0x5f4] sm:$0xf0]  ;;  %v2578_v35 = vor.u32 %v3054_v28, %v2577_v27  ;;  %v2705_v38 = vld [vmem:[#allocation2 + $0x588] sm:$0xf]  ;;  %v2908_v27 = vld [vmem:[#allocation2 + $0xc] sm:$0xf] }
  0x77   :  { %1448 = vmatpush.bf16.msrb.mxu1 %v2066_v58  ;;  %v2626_v58 = vor.u32 %v3066_v40, %v2625_v39  ;;  %v3086_v39 = vld [vmem:[#allocation2 + $0x594] sm:$0xf0]  ;;  %v2561_v40 = vld [vmem:[#allocation2 + $0x468] sm:$0xf]  ;;  %v2003_v28 = vld [vmem:[#allocation2 + $0x18] sm:$0xf0] }
  0x78   :  { %1461 = vmatpush.bf16.msra.mxu3 %v2210_v53  ;;  %v2942_v53 = vld [vmem:[#allocation2 + $0x114] sm:$0xf0]  ;;  %v2706_v46 = vor.u32 %v3086_v39, %v2705_v38  ;;  %v2545_v56 = vld [vmem:[#allocation2 + $0x448] sm:$0xf]  ;;  %v2499_v33 = vld [vmem:[#allocation2 + $0x3f8] sm:$0xf0]  ;;  %v2006_v39 = vor.u32 %v2908_v27, %v2003_v28 }
  0x79   :  { %1489 = vmatpush.bf16.msra.mxu2 %v2466_v49  ;;  %v2769_v49 = vld [vmem:[#allocation2 + $0x608] sm:$0xf]  ;;  %v2130_v5 = vor.u32 %v2942_v53, %v2129_v43  ;;  %v2956_v43 = vld [vmem:[#allocation2 + $0x18c] sm:$0xf]  ;;  %v3082_v53 = vld [vmem:[#allocation2 + $0x574] sm:$0xf0] }
  0x7a   :  { %1477 = vmatpush.bf16.msrb.mxu0 %v2306_v11  ;;  %v2770_v2 = vor.u32 %v3102_v51, %v2769_v49  ;;  %v2198_v51 = vor.u32 %v2956_v43, %v2195_v44  ;;  %v2996_v38 = vld [vmem:[#allocation2 + $0x2cc] sm:$0xf]  ;;  %v2131_v43 = vld [vmem:[#allocation2 + $0x118] sm:$0xf0] }
  0x7b   :  { %1449 = vmatpush.bf16.msrb.mxu1 %v2050_v7  ;;  %2776 = vmatmul.msk.bf16.vlgmr.msrb.gmra.mxu3 %vm1245_vm0, %v3275_v50  ;;  %v2754_v7 = vor.u32 %v3098_v62, %v2753_v61  ;;  %v2435_v28 = vld [vmem:[#allocation2 + $0x378] sm:$0xf0] }
  0x7c   :  { %1462 = vmatpush.bf16.msra.mxu3 %v2194_v4  ;;  %v2243_v4 = vld [vmem:[#allocation2 + $0x1f8] sm:$0xf0] }
  0x7d   :  { %1490 = vmatpush.bf16.msra.mxu2 %v2450_v1  ;;  %v3062_v1 = vld [vmem:[#allocation2 + $0x4d4] sm:$0xf0]  ;;  %v2246_v12 = vor.u32 %v2968_v3, %v2243_v4  ;;  %v2673_v3 = vld [vmem:[#allocation2 + $0x548] sm:$0xf] }
  0x7e   :  { %1478 = vmatpush.bf16.msrb.mxu0 %v2290_v23  ;;  %v2610_v11 = vor.u32 %v3062_v1, %v2609_v63  ;;  %v2594_v23 = vor.u32 %v3058_v16, %v2593_v15  ;;  %v2916_v63 = vld [vmem:[#allocation2 + $0x4c] sm:$0xf]  ;;  %v2546_v1 = vor.u32 %v3046_v57, %v2545_v56  ;;  %v3078_v4 = vld [vmem:[#allocation2 + $0x554] sm:$0xf0]  ;;  %v2657_v16 = vld [vmem:[#allocation2 + $0x528] sm:$0xf] }
  0x7f   :  { %1450 = vmatpush.bf16.msrb.mxu1 %v2034_v20  ;;  %v3060_v56 = vld [vmem:[#allocation2 + $0x4cc] sm:$0xf]  ;;  %v2611_v57 = vld [vmem:[#allocation2 + $0x4d8] sm:$0xf0] }
  0x80   :  { %1463 = vmatpush.bf16.msra.mxu3 %v2178_v17  ;;  %v2964_v17 = vld [vmem:[#allocation2 + $0x1cc] sm:$0xf] }
  0x81   :  { %1491 = vmatpush.bf16.msra.mxu2 %v2434_v14  ;;  %v3094_v14 = vld [vmem:[#allocation2 + $0x5d4] sm:$0xf0]  ;;  %v2230_v24 = vor.u32 %v2964_v17, %v2227_v18  ;;  %v2513_v18 = vld [vmem:[#allocation2 + $0x408] sm:$0xf] }
  0x82   :  { %1479 = vmatpush.bf16.msrb.mxu0 %v2274_v36  ;;  %v2738_v20 = vor.u32 %v3094_v14, %v2737_v13  ;;  %v2019_v13 = vld [vmem:[#allocation2 + $0x38] sm:$0xf0]  ;;  %v3074_v17 = vld [vmem:[#allocation2 + $0x534] sm:$0xf0] }
  0x83   :  { %1451 = vmatpush.bf16.msrb.mxu1 %v2018_v32 }
  0x84   :  { %1464 = vmatpush.bf16.msra.mxu3 %v2162_v29  ;;  %v2960_v29 = vld [vmem:[#allocation2 + $0x1ac] sm:$0xf] }
  0x85   :  { %1492 = vmatpush.bf16.msra.mxu2 %v2418_v26  ;;  %v3090_v26 = vld [vmem:[#allocation2 + $0x5b4] sm:$0xf0]  ;;  %v2214_v36 = vor.u32 %v2960_v29, %v2211_v30 }
  0x86   :  { %1480 = vmatpush.bf16.msrb.mxu0 %v2258_v59  ;;  %v2722_v32 = vor.u32 %v3090_v26, %v2721_v25  ;;  %v2179_v59 = vld [vmem:[#allocation2 + $0x178] sm:$0xf0]  ;;  %v2658_v25 = vor.u32 %v3074_v17, %v2657_v16  ;;  %v2641_v26 = vld [vmem:[#allocation2 + $0x508] sm:$0xf] }
  0x87   :  { %1452 = vmatpush.bf16.msrb.mxu1 %v2002_v52  ;;  %v2689_v52 = vld [vmem:[#allocation2 + $0x568] sm:$0xf]  ;;  %v2451_v17 = vld [vmem:[#allocation2 + $0x398] sm:$0xf0] }
  0x88   :  { %1465 = vmatpush.bf16.msra.mxu3 %v2146_v47  ;;  %v2920_v47 = vld [vmem:[#allocation2 + $0x6c] sm:$0xf]  ;;  %v2690_v62 = vor.u32 %v3082_v53, %v2689_v52  ;;  %v2483_v53 = vld [vmem:[#allocation2 + $0x3d8] sm:$0xf0] }
  0x89   :  { %1493 = vmatpush.bf16.msra.mxu2 %v2402_v41  ;;  %1481 = vmatmul.bf16.vlgmr.msrb.gmra.mxu0 %v3251_v54  ;;  %v3050_v41 = vld [vmem:[#allocation2 + $0x474] sm:$0xf0]  ;;  %v2054_v61 = vor.u32 %v2920_v47, %v2051_v48 }
  0x8a   :  { %1536 = vmatpush.bf16.msra.mxu0 %v2770_v2  ;;  %1453 = vmatmul.bf16.vlgmr.msrb.gmra.mxu1 %v3253_v55  ;;  %v2562_v49 = vor.u32 %v3050_v41, %v2561_v40  ;;  %v2355_v40 = vld [vmem:[#allocation2 + $0x2d8] sm:$0xf0]  ;;  %v2940_v41 = vld [vmem:[#allocation2 + $0x10c] sm:$0xf] }
  0x8b   :  { %1501 = vmatpush.bf16.msra.mxu1 %v2626_v58  ;;  %v2952_v58 = vld [vmem:[#allocation2 + $0x16c] sm:$0xf]  ;;  %v2134_v52 = vor.u32 %v2940_v41, %v2131_v43  ;;  %v2547_v43 = vld [vmem:[#allocation2 + $0x458] sm:$0xf0] }
  0x8c   :  { %1466 = vmatpush.bf16.msra.mxu3 %v2130_v5  ;;  %v2182_v2 = vor.u32 %v2952_v58, %v2179_v59  ;;  %v2529_v5 = vld [vmem:[#allocation2 + $0x428] sm:$0xf]  ;;  %v2992_v59 = vld [vmem:[#allocation2 + $0x2ac] sm:$0xf] }
  0x8d   :  { %1494 = vmatpush.bf16.msra.mxu2 %v2386_v0  ;;  %v2035_v0 = vld [vmem:[#allocation2 + $0x58] sm:$0xf0]  ;;  %v3044_v41 = vld [vmem:[#allocation2 + $0x44c] sm:$0xf] }
  0x8e   :  { %1557 = vmatpush.bf16.msrb.mxu0 %v2246_v12  ;;  %v2038_v10 = vor.u32 %v2916_v63, %v2035_v0  ;;  %v2912_v12 = vld [vmem:[#allocation2 + $0x2c] sm:$0xf]  ;;  %v2739_v63 = vld [vmem:[#allocation2 + $0x5d8] sm:$0xf0] }
  0x8f   :  { %1502 = vmatpush.bf16.msra.mxu1 %v2610_v11  ;;  %1467 = vmatmul.bf16.vlgmr.msra.gmra.mxu3 %v3265_v8  ;;  %v2674_v11 = vor.u32 %v3078_v4, %v2673_v3  ;;  %v2022_v22 = vor.u32 %v2912_v12, %v2019_v13  ;;  %v2467_v4 = vld [vmem:[#allocation2 + $0x3b8] sm:$0xf0] }
  0x90   :  { %1515 = vmatpush.bf16.msrb.mxu3 %v2754_v7  ;;  %1495 = vmatmul.bf16.vlgmr.msra.gmra.mxu2 %v3255_v60  ;;  %v2948_v7 = vld [vmem:[#allocation2 + $0x14c] sm:$0xf]  ;;  %v2723_v12 = vld [vmem:[#allocation2 + $0x5b8] sm:$0xf0] }
  0x91   :  { %1543 = vmatpush.bf16.msrb.mxu2 %v2118_v6  ;;  %v3042_v6 = vld [vmem:[#allocation2 + $0x434] sm:$0xf0]  ;;  %v2166_v15 = vor.u32 %v2948_v7, %v2163_v9  ;;  %v2988_v9 = vld [vmem:[#allocation2 + $0x28c] sm:$0xf] }
  0x92   :  { %1558 = vmatpush.bf16.msrb.mxu0 %v2230_v24  ;;  %v2530_v14 = vor.u32 %v3042_v6, %v2529_v5  ;;  %v2371_v24 = vld [vmem:[#allocation2 + $0x2f8] sm:$0xf0]  ;;  %v3056_v5 = vld [vmem:[#allocation2 + $0x4ac] sm:$0xf] }
  0x93   :  { %1503 = vmatpush.bf16.msra.mxu1 %v2594_v23  ;;  %v3000_v23 = vld [vmem:[#allocation2 + $0x2ec] sm:$0xf]  ;;  %v2595_v6 = vld [vmem:[#allocation2 + $0x4b8] sm:$0xf0] }
  0x94   :  { %1516 = vmatpush.bf16.msrb.mxu3 %v2738_v20  ;;  %v2944_v20 = vld [vmem:[#allocation2 + $0x12c] sm:$0xf]  ;;  %v2374_v34 = vor.u32 %v3000_v23, %v2371_v24 }
  0x95   :  { %1544 = vmatpush.bf16.msrb.mxu2 %v2102_v19  ;;  %v3038_v19 = vld [vmem:[#allocation2 + $0x414] sm:$0xf0]  ;;  %v2150_v30 = vor.u32 %v2944_v20, %v2147_v21  ;;  %v2984_v21 = vld [vmem:[#allocation2 + $0x26c] sm:$0xf] }
  0x96   :  { %1559 = vmatpush.bf16.msrb.mxu0 %v2214_v36  ;;  %v2514_v29 = vor.u32 %v3038_v19, %v2513_v18  ;;  %v2627_v36 = vld [vmem:[#allocation2 + $0x4f8] sm:$0xf0]  ;;  %v3052_v18 = vld [vmem:[#allocation2 + $0x48c] sm:$0xf] }
  0x97   :  { %1504 = vmatpush.bf16.msra.mxu1 %v2578_v35  ;;  %v3064_v35 = vld [vmem:[#allocation2 + $0x4ec] sm:$0xf]  ;;  %v2579_v19 = vld [vmem:[#allocation2 + $0x498] sm:$0xf0] }
  0x98   :  { %1517 = vmatpush.bf16.msrb.mxu3 %v2722_v32  ;;  %v3032_v32 = vld [vmem:[#allocation2 + $0x3ec] sm:$0xf]  ;;  %v2630_v48 = vor.u32 %v3064_v35, %v2627_v36 }
  0x99   :  { %1545 = vmatpush.bf16.msrb.mxu2 %v2086_v31  ;;  %2777 = vmatmul.msk.bf16.vlgmr.msra.gmra.mxu0 %vm1245_vm0, %v3275_v50  ;;  %v3070_v31 = vld [vmem:[#allocation2 + $0x514] sm:$0xf0]  ;;  %v2502_v47 = vor.u32 %v3032_v32, %v2499_v33  ;;  %v3084_v23 = vld [vmem:[#allocation2 + $0x58c] sm:$0xf] }
  0x9a   :  { %1560 = vmatpush.bf16.msrb.mxu0 %v2198_v51  ;;  %v2642_v44 = vor.u32 %v3070_v31, %v2641_v26  ;;  %v2358_v51 = vor.u32 %v2996_v38, %v2355_v40  ;;  %v3016_v26 = vld [vmem:[#allocation2 + $0x36c] sm:$0xf]  ;;  %v2419_v40 = vld [vmem:[#allocation2 + $0x358] sm:$0xf0] }
  0x9b   :  { %1505 = vmatpush.bf16.msra.mxu1 %v2562_v49  ;;  %v3028_v49 = vld [vmem:[#allocation2 + $0x3cc] sm:$0xf]  ;;  %v2438_v35 = vor.u32 %v3016_v26, %v2435_v28  ;;  %v3109_v26 = vld [vmem:[%s3435_s3 + $0x30] sm:$0xff] }
  0x9c   :  { %1518 = vmatpush.bf16.msrb.mxu3 %v2706_v46  ;;  %v2755_v46 = vld [vmem:[#allocation2 + $0x5f8] sm:$0xf0]  ;;  %v2486_v0 = vor.u32 %v3028_v49, %v2483_v53  ;;  %v2980_v32 = vld [vmem:[#allocation2 + $0x24c] sm:$0xf] }
  0x9d   :  { %1546 = vmatpush.bf16.msrb.mxu2 %v2070_v45  ;;  %v3096_v45 = vld [vmem:[#allocation2 + $0x5ec] sm:$0xf] }
  0x9e   :  { %1561 = vmatpush.bf16.msrb.mxu0 %v2182_v2  ;;  %v2758_v58 = vor.u32 %v3096_v45, %v2755_v46  ;;  %v3024_v2 = vld [vmem:[#allocation2 + $0x3ac] sm:$0xf]  ;;  %v2275_v46 = vld [vmem:[#allocation2 + $0x238] sm:$0xf0] }
  0x9f   :  { %1506 = vmatpush.bf16.msra.mxu1 %v2546_v1  ;;  %v2614_v1 = vor.u32 %v3060_v56, %v2611_v57  ;;  %v2470_v13 = vor.u32 %v3024_v2, %v2467_v4  ;;  %v3080_v33 = vld [vmem:[#allocation2 + $0x56c] sm:$0xf]  ;;  %v2403_v57 = vld [vmem:[#allocation2 + $0x338] sm:$0xf0] }
  0xa0   :  { %1519 = vmatpush.bf16.msrb.mxu3 %v2690_v62  ;;  %v3092_v62 = vld [vmem:[#allocation2 + $0x5cc] sm:$0xf]  ;;  %v2659_v2 = vld [vmem:[#allocation2 + $0x538] sm:$0xf0] }
  0xa1   :  { %1547 = vmatpush.bf16.msrb.mxu2 %v2054_v61  ;;  %v2339_v61 = vld [vmem:[#allocation2 + $0x2b8] sm:$0xf0]  ;;  %v2742_v7 = vor.u32 %v3092_v62, %v2739_v63  ;;  %v3012_v38 = vld [vmem:[#allocation2 + $0x34c] sm:$0xf] }
  0xa2   :  { %1562 = vmatpush.bf16.msrb.mxu0 %v2166_v15  ;;  %v2342_v3 = vor.u32 %v2992_v59, %v2339_v61  ;;  %v3020_v15 = vld [vmem:[#allocation2 + $0x38c] sm:$0xf]  ;;  %v2422_v49 = vor.u32 %v3012_v38, %v2419_v40  ;;  %v2531_v59 = vld [vmem:[#allocation2 + $0x438] sm:$0xf0] }
  0xa3   :  { %1507 = vmatpush.bf16.msra.mxu1 %v2530_v14  ;;  %v2598_v14 = vor.u32 %v3056_v5, %v2595_v6  ;;  %v2454_v24 = vor.u32 %v3020_v15, %v2451_v17  ;;  %v2976_v45 = vld [vmem:[#allocation2 + $0x22c] sm:$0xf]  ;;  %v2771_v4 = vld [vmem:[#allocation2 + $0x618] sm:$0xf0] }
  0xa4   :  { %1520 = vmatpush.bf16.msrb.mxu3 %v2674_v11  ;;  %v3088_v11 = vld [vmem:[#allocation2 + $0x5ac] sm:$0xf]  ;;  %v2278_v56 = vor.u32 %v2976_v45, %v2275_v46  ;;  %v3105_v46 = vld [vmem:[%s3435_s3 + $0x10] sm:$0xff] }
  0xa5   :  { %1548 = vmatpush.bf16.msrb.mxu2 %v2038_v10  ;;  %v2323_v10 = vld [vmem:[#allocation2 + $0x298] sm:$0xf0]  ;;  %v2726_v20 = vor.u32 %v3088_v11, %v2723_v12  ;;  %v2972_v63 = vld [vmem:[#allocation2 + $0x20c] sm:$0xf] }
  0xa6   :  { %1563 = vmatpush.bf16.msrb.mxu0 %v2150_v30  ;;  %v2326_v16 = vor.u32 %v2988_v9, %v2323_v10  ;;  %v2563_v30 = vld [vmem:[#allocation2 + $0x478] sm:$0xf0]  ;;  %v3004_v10 = vld [vmem:[#allocation2 + $0x30c] sm:$0xf] }
  0xa7   :  { %1508 = vmatpush.bf16.msra.mxu1 %v2514_v29  ;;  %v3048_v29 = vld [vmem:[#allocation2 + $0x46c] sm:$0xf]  ;;  %v2387_v11 = vld [vmem:[#allocation2 + $0x318] sm:$0xf0] }
  0xa8   :  { %1521 = vmatpush.bf16.msrb.mxu3 %v2658_v25  ;;  %v2582_v25 = vor.u32 %v3052_v18, %v2579_v19  ;;  %v2566_v36 = vor.u32 %v3048_v29, %v2563_v30  ;;  %v3068_v17 = vld [vmem:[#allocation2 + $0x50c] sm:$0xf]  ;;  %v2643_v18 = vld [vmem:[#allocation2 + $0x518] sm:$0xf0]  ;;  %v2390_v19 = vor.u32 %v3004_v10, %v2387_v11 }
  0xa9   :  { %1549 = vmatpush.bf16.msrb.mxu2 %v2022_v22  ;;  %v2307_v22 = vld [vmem:[#allocation2 + $0x278] sm:$0xf0]  ;;  %v1258_v53 = vpop.f32.mrf.mxu0 }
  0xaa   :  { %1509 = vmatmul.bf16.vlgmr.msra.gmra.mxu1 %v3291_v37  ;;  %1564 = vmatpush.bf16.msrb.mxu0 %v2134_v52  ;;  %v2310_v27 = vor.u32 %v2984_v21, %v2307_v22  ;;  %v3008_v52 = vld [vmem:[#allocation2 + $0x32c] sm:$0xf]  ;;  %v3110_v21 = vld [vmem:[%s3435_s3 + $0x38] sm:$0xff] }
  0xab   :  { %1571 = vmatpush.bf16.msrb.mxu1 %v2374_v34  ;;  %v2691_v34 = vld [vmem:[#allocation2 + $0x578] sm:$0xf0]  ;;  %v2406_v5 = vor.u32 %v3008_v52, %v2403_v57  ;;  %v3103_v57 = vld [vmem:[%s3435_s3] sm:$0xff] }
  0xac   :  { %1522 = vmatpush.bf16.msrb.mxu3 %v2642_v44  ;;  %v2694_v44 = vor.u32 %v3080_v33, %v2691_v34  ;;  %v3107_v33 = vld [vmem:[%s3435_s3 + $0x20] sm:$0xff] }
  0xad   :  { %1550 = vmatpush.bf16.msrb.mxu2 %v2006_v39  ;;  %1565 = vmatmul.bf16.vlgmr.msrb.gmra.mxu0 %v3265_v8  ;;  %v2291_v8 = vld [vmem:[#allocation2 + $0x258] sm:$0xf0]  ;;  %v1272_v61 = vpop.f32.mrf.mxu1 }
  0xae   :  { %1613 = vmatpush.bf16.msra.mxu0 %v2758_v58  ;;  %v2294_v39 = vor.u32 %v2980_v32, %v2291_v8  ;;  %v3040_v58 = vld [vmem:[#allocation2 + $0x42c] sm:$0xf] }
  0xaf   :  { %1572 = vmatpush.bf16.msrb.mxu1 %v2358_v51  ;;  %1523 = vmatmul.bf16.vlgmr.msrb.gmra.mxu3 %v3293_v42  ;;  %v2550_v51 = vor.u32 %v3044_v41, %v2547_v43  ;;  %v2534_v6 = vor.u32 %v3040_v58, %v2531_v59  ;;  %v3117_v41 = vld [vmem:[%s3435_s3 + $0x70] sm:$0xff] }
  0xb0   :  { %1585 = vmatpush.bf16.msra.mxu3 %v2502_v47  ;;  %1551 = vmatmul.bf16.vlgmr.msrb.gmra.mxu2 %v3253_v55  ;;  %v2707_v55 = vld [vmem:[#allocation2 + $0x598] sm:$0xf0]  ;;  %v3076_v47 = vld [vmem:[#allocation2 + $0x54c] sm:$0xf] }
  0xb1   :  { %1599 = vmatpush.bf16.msra.mxu2 %v2630_v48  ;;  %v2710_v31 = vor.u32 %v3084_v23, %v2707_v55  ;;  %v2675_v48 = vld [vmem:[#allocation2 + $0x558] sm:$0xf0]  ;;  %v2646_v23 = vor.u32 %v3068_v17, %v2643_v18  ;;  %v1260_v55 = vpop.f32.mrf.mxu0 }
  0xb2   :  { %1614 = vmatpush.bf16.msra.mxu0 %v2742_v7  ;;  %v2678_v62 = vor.u32 %v3076_v47, %v2675_v48  ;;  %v1286_v7 = vpop.f32.mrf.mxu2  ;;  %v3116_v48 = vld [vmem:[%s3435_s3 + $0x68] sm:$0xff] }
  0xb3   :  { %1573 = vmatpush.bf16.msrb.mxu1 %v2342_v3  ;;  %v3100_v3 = vld [vmem:[#allocation2 + $0x60c] sm:$0xf] }
  0xb4   :  { %1586 = vmatpush.bf16.msra.mxu3 %v2486_v0  ;;  %v2259_v0 = vld [vmem:[#allocation2 + $0x218] sm:$0xf0]  ;;  %v2774_v15 = vor.u32 %v3100_v3, %v2771_v4  ;;  %v3111_v4 = vld [vmem:[%s3435_s3 + $0x40] sm:$0xff] }
  0xb5   :  { %1600 = vmatpush.bf16.msra.mxu2 %v2614_v1  ;;  %v3072_v1 = vld [vmem:[#allocation2 + $0x52c] sm:$0xf]  ;;  %v2262_v9 = vor.u32 %v2972_v63, %v2259_v0  ;;  %v3113_v0 = vld [vmem:[%s3435_s3 + $0x50] sm:$0xff] }
  0xb6   :  { %1615 = vmatpush.bf16.msra.mxu0 %v2726_v20  ;;  %v2662_v12 = vor.u32 %v3072_v1, %v2659_v2  ;;  %v3112_v1 = vld [vmem:[%s3435_s3 + $0x48] sm:$0xff] }
  0xb7   :  { %1574 = vmatpush.bf16.msrb.mxu1 %v2326_v16  ;;  %v3318_v16 = vld [vmem:[%s3434_s2] sm:$0xf] }
  0xb8   :  { %1587 = vmatpush.bf16.msra.mxu3 %v2470_v13  ;;  %v3036_v13 = vld [vmem:[#allocation2 + $0x40c] sm:$0xf]  ;;  %v257_v22 = vperm.slane %v3318_v16, 0 }
  0xb9   :  { %1601 = vmatpush.bf16.msra.mxu2 %v2598_v14  ;;  %v2515_v14 = vld [vmem:[#allocation2 + $0x418] sm:$0xf0] }
  0xba   :  { %1616 = vmatpush.bf16.msra.mxu0 %v2710_v31  ;;  %v2518_v20 = vor.u32 %v3036_v13, %v2515_v14  ;;  %v1261_v28 = vadd.f32 %v1260_v55, %v257_v22  ;;  %v1288_v29 = vpop.f32.mrf.mxu2  ;;  %v3125_v55 = vld [vmem:[%s3435_s3 + $0xb0] sm:$0xff] }
  0xbb   :  { %1575 = vmatpush.bf16.msrb.mxu1 %v2310_v27  ;;  %v1259_v27 = vadd.f32 %v1258_v53, %v257_v22  ;;  %v3115_v53 = vld [vmem:[%s3435_s3 + $0x60] sm:$0xff] }
  0xbc   :  { %1588 = vmatpush.bf16.msra.mxu3 %v2454_v24  ;;  %v1274_v24 = vpop.f32.mrf.mxu1 }
  0xbd   :  { %1602 = vmatpush.bf16.msra.mxu2 %v2582_v25  ;;  %v1300_v25 = vpop.f32.mrf.mxu3  ;;  %v1273_v30 = vadd.f32 %v1272_v61, %v1259_v27  ;;  %v1275_v31 = vadd.f32 %v1274_v24, %v1261_v28  ;;  %v3114_v61 = vld [vmem:[%s3435_s3 + $0x58] sm:$0xff] }
  0xbe   :  { %1617 = vmatpush.bf16.msra.mxu0 %v2694_v44 }
  0xbf   :  { %1576 = vmatpush.bf16.msrb.mxu1 %v2294_v39  ;;  %v1287_v34 = vadd.f32 %v1286_v7, %v1273_v30  ;;  %v258_v7 = vperm.slane %v3318_v16, 1 }
  0xc0   :  { %1589 = vmatpush.bf16.msra.mxu3 %v2438_v35 }
  0xc1   :  { %1603 = vmatpush.bf16.msra.mxu2 %v2566_v36  ;;  %v3106_v36 = vld [vmem:[%s3435_s3 + $0x18] sm:$0xff]  ;;  %v1301_v38 = vadd.f32 %v1300_v25, %v1287_v34 }
  0xc2   :  { %1618 = vmatpush.bf16.msra.mxu0 %v2678_v62 }
  0xc3   :  { %1577 = vmatpush.bf16.msrb.mxu1 %v2278_v56 }
  0xc4   :  { %1590 = vmatpush.bf16.msra.mxu3 %v2422_v49 }
  0xc5   :  { %1604 = vmatpush.bf16.msra.mxu2 %v2550_v51  ;;  %v1302_v35 = vpop.f32.mrf.mxu3 }
  0xc6   :  { %1619 = vmatpush.bf16.msra.mxu0 %v2662_v12  ;;  %v1314_v32 = vpop.f32.mrf.mxu0 }
  0xc7   :  { %1578 = vmatpush.bf16.msrb.mxu1 %v2262_v9  ;;  %v1328_v8 = vpop.f32.mrf.mxu1  ;;  %v1315_v43 = vadd.f32 %v1314_v32, %v1301_v38  ;;  %v3123_v32 = vld [vmem:[%s3435_s3 + $0xa0] sm:$0xff] }
  0xc8   :  { %1591 = vmatpush.bf16.msra.mxu3 %v2406_v5 }
  0xc9   :  { %1605 = vmatpush.bf16.msra.mxu2 %v2534_v6  ;;  %v1329_v49 = vadd.f32 %v1328_v8, %v1315_v43 }
  0xca   :  { %1579 = vmatmul.bf16.vlgmr.msrb.gmra.mxu1 %v3251_v54  ;;  %1620 = vmatpush.bf16.msra.mxu0 %v2646_v23  ;;  %v3108_v54 = vld [vmem:[%s3435_s3 + $0x28] sm:$0xff] }
  0xcb   :  { %1634 = vmatpush.bf16.msra.mxu1 %v2774_v15 }
  0xcc   :  { %1592 = vmatpush.bf16.msra.mxu3 %v2390_v19 }
  0xcd   :  { %1606 = vmatpush.bf16.msra.mxu2 %v2518_v20  ;;  %1621 = vmatmul.bf16.vlgmr.msra.gmra.mxu0 %v3293_v42  ;;  %v3118_v42 = vld [vmem:[%s3435_s3 + $0x78] sm:$0xff] }
  0xce   :  { %v1316_v40 = vpop.f32.mrf.mxu0  ;;  %v1356_v59 = vpop.f32.mrf.mxu3 }
  0xcf   :  { %1593 = vmatmul.bf16.vlgmr.msra.gmra.mxu3 %v3255_v60  ;;  %v1289_v60 = vadd.f32 %v1288_v29, %v1275_v31  ;;  %1927 = vmatpush.bf16.msrb.mxu1 %v3118_v42  ;;  %v1330_v45 = vpop.f32.mrf.mxu1  ;;  %v1357_v11 = vadd.f32 %v1356_v59, %v258_v7 }
  0xd0   :  { %1913 = vmatpush.bf16.msrb.mxu3 %v3110_v21  ;;  %1607 = vmatmul.bf16.vlgmr.msra.gmra.mxu2 %v3291_v37  ;;  %v1342_v37 = vpop.f32.mrf.mxu2  ;;  %v3126_v21 = vld [vmem:[%s3435_s3 + $0xb8] sm:$0xff] }
  0xd1   :  { %v1303_v39 = vadd.f32 %v1302_v35, %v1289_v60  ;;  %v1343_v56 = vadd.f32 %v1342_v37, %v1329_v49  ;;  %1941 = vmatpush.bf16.msrb.mxu2 %v3126_v21  ;;  %v3122_v37 = vld [vmem:[%s3435_s3 + $0x98] sm:$0xff] }
  0xd3   :  { %v1317_v44 = vadd.f32 %v1316_v40, %v1303_v39  ;;  %1928 = vmatpush.bf16.msrb.mxu1 %v3117_v41  ;;  %v1641_v62 = vmax.f32 %v1343_v56, 0.0  ;;  %v3120_v39 = vld [vmem:[%s3435_s3 + $0x88] sm:$0xff]  ;;  %v3119_v40 = vld [vmem:[%s3435_s3 + $0x80] sm:$0xff] }
  0xd4   :  { %1914 = vmatpush.bf16.msrb.mxu3 %v3109_v26 }
  0xd5   :  { %v1331_v47 = vadd.f32 %v1330_v45, %v1317_v44  ;;  %1942 = vmatpush.bf16.msrb.mxu2 %v3125_v55  ;;  %v259_v44 = vperm.slane %v3318_v16, 2 }
  0xd6   :  { %v1358_v3 = vpop.f32.mrf.mxu3 }
  0xd7   :  { %1929 = vmatpush.bf16.msrb.mxu1 %v3116_v48  ;;  %v1359_v12 = vadd.f32 %v1358_v3, %v258_v7  ;;  %v3133_v48 = vld [vmem:[%s3435_s3 + $0xf0] sm:$0xff] }
  0xd8   :  { %1915 = vmatpush.bf16.msrb.mxu3 %v3108_v54  ;;  %v1344_v51 = vpop.f32.mrf.mxu2  ;;  %v3124_v54 = vld [vmem:[%s3435_s3 + $0xa8] sm:$0xff] }
  0xd9   :  { %v1345_v52 = vadd.f32 %v1344_v51, %v1331_v47  ;;  %1943 = vmatpush.bf16.msrb.mxu2 %v3124_v54 }
  0xda   :  { %2778 = vmatmul.msk.bf16.vlgmr.msra.gmra.mxu1 %vm1245_vm0, %v3275_v50  ;;  %v3104_v50 = vld [vmem:[%s3435_s3 + $0x8] sm:$0xff] }
  0xdb   :  { %1930 = vmatpush.bf16.msrb.mxu1 %v3115_v53  ;;  %v1645_v58 = vmax.f32 %v1345_v52, 0.0 }
  0xdc   :  { %1916 = vmatpush.bf16.msrb.mxu3 %v3107_v33 }
  0xdd   :  { %v1649_v63 = vpack.c.bf16 %v1645_v58, %v1641_v62  ;;  %1944 = vmatpush.bf16.msrb.mxu2 %v3123_v32 }
  0xdf   :  { %1931 = vmatpush.bf16.msrb.mxu1 %v3114_v61  ;;  %v3131_v61 = vld [vmem:[%s3435_s3 + $0xe0] sm:$0xff] }
  0xe0   :  { %1917 = vmatpush.bf16.msrb.mxu3 %v3106_v36  ;;  %v1370_v2 = vpop.f32.mrf.mxu2  ;;  %v3121_v36 = vld [vmem:[%s3435_s3 + $0x90] sm:$0xff] }
  0xe1   :  { %v1371_v14 = vadd.f32 %v1370_v2, %v1357_v11  ;;  %1945 = vmatpush.bf16.msrb.mxu2 %v3122_v37 }
  0xe3   :  { %1932 = vmatpush.bf16.msrb.mxu1 %v3113_v0 }
  0xe4   :  { %1918 = vmatpush.bf16.msrb.mxu3 %v3105_v46  ;;  %v3134_v46 = vld [vmem:[%s3435_s3 + $0xf8] sm:$0xff] }
  0xe5   :  { %1946 = vmatpush.bf16.msrb.mxu2 %v3121_v36  ;;  %1955 = vmatpush.bf16.msrb.mxu0 %v3134_v46 }
  0xe6   :  { %v1384_v5 = vpop.f32.mrf.mxu0 }
  0xe7   :  { %1933 = vmatpush.bf16.msrb.mxu1 %v3112_v1  ;;  %v1398_v10 = vpop.f32.mrf.mxu1  ;;  %v1385_v19 = vadd.f32 %v1384_v5, %v1371_v14 }
  0xe8   :  { %1919 = vmatpush.bf16.msrb.mxu3 %v3104_v50  ;;  %v1372_v9 = vpop.f32.mrf.mxu2 }
  0xe9   :  { %v1373_v18 = vadd.f32 %v1372_v9, %v1359_v12  ;;  %v1399_v23 = vadd.f32 %v1398_v10, %v1385_v19  ;;  %1947 = vmatpush.bf16.msrb.mxu2 %v3120_v39  ;;  %1956 = vmatpush.bf16.msrb.mxu0 %v3133_v48  ;;  %v3129_v10 = vld [vmem:[%s3435_s3 + $0xd0] sm:$0xff] }
  0xeb   :  { %1934 = vmatpush.bf16.msrb.mxu1 %v3111_v4  ;;  %v3130_v4 = vld [vmem:[%s3435_s3 + $0xd8] sm:$0xff] }
  0xec   :  { %1920 = vmatpush.bf16.msrb.mxu3 %v3103_v57  ;;  %v3132_v57 = vld [vmem:[%s3435_s3 + $0xe8] sm:$0xff] }
  0xed   :  { %1948 = vmatpush.bf16.msrb.mxu2 %v3119_v40  ;;  %1957 = vmatpush.bf16.msrb.mxu0 %v3132_v57 }
  0xee   :  { %v1412_v6 = vpop.f32.mrf.mxu3  ;;  %v1386_v15 = vpop.f32.mrf.mxu0 }
  0xef   :  { %1921 = vmatmul.bf16.vlgmr.msrb.gmra.mxu3 %v1649_v63  ;;  %v1387_v20 = vadd.f32 %v1386_v15, %v1373_v18  ;;  %v1400_v22 = vpop.f32.mrf.mxu1  ;;  %v1413_v25 = vadd.f32 %v1412_v6, %v1399_v23  ;;  %v260_v23 = vperm.slane %v3318_v16, 3 }
  0xf1   :  { %v1401_v26 = vadd.f32 %v1400_v22, %v1387_v20  ;;  %1958 = vmatpush.bf16.msrb.mxu0 %v3131_v61  ;;  %v3127_v22 = vld [vmem:[%s3435_s3 + $0xc0] sm:$0xff] }
  0xf3   :  { %v1426_v17 = vpop.f32.mrf.mxu2 }
  0xf4   :  { %v1427_v29 = vadd.f32 %v1426_v17, %v1413_v25  ;;  %v3128_v17 = vld [vmem:[%s3435_s3 + $0xc8] sm:$0xff] }
  0xf5   :  { %1959 = vmatpush.bf16.msrb.mxu0 %v3130_v4 }
  0xf6   :  { %v1414_v13 = vpop.f32.mrf.mxu3 }
  0xf7   :  { %v1415_v27 = vadd.f32 %v1414_v13, %v1401_v26 }
  0xf9   :  { %1960 = vmatpush.bf16.msrb.mxu0 %v3129_v10 }
  0xfb   :  { %v1428_v28 = vpop.f32.mrf.mxu2 }
  0xfc   :  { %v1429_v30 = vadd.f32 %v1428_v28, %v1415_v27 }
  0xfd   :  { %1961 = vmatpush.bf16.msrb.mxu0 %v3128_v17 }
  0xfe   :  { %v1440_v24 = vpop.f32.mrf.mxu3 }
  0xff   :  { %v1441_v31 = vadd.f32 %v1440_v24, %v1427_v29 }
 0x101   :  { %v1642_v34 = vmax.f32 %v1441_v31, 0.0  ;;  %1962 = vmatpush.bf16.msrb.mxu0 %v3127_v22 }
 0x106   :  { %v1442_v8 = vpop.f32.mrf.mxu3  ;;  %v1482_v42 = vpop.f32.mrf.mxu0 }
 0x107   :  { %v1443_v33 = vadd.f32 %v1442_v8, %v1429_v30  ;;  %v1454_v38 = vpop.f32.mrf.mxu1 }
 0x108   :  { %v1455_v47 = vadd.f32 %v1454_v38, %v259_v44 }
 0x109   :  { %v1646_v60 = vmax.f32 %v1443_v33, 0.0 }
 0x10b   :  { %v1650_v35 = vpack.c.bf16 %v1646_v60, %v1642_v34 }
 0x10d   :  { %1935 = vmatmul.bf16.vlgmr.msrb.gmra.mxu1 %v1650_v35 }
 0x10e   :  { %v1484_v43 = vpop.f32.mrf.mxu0 }
 0x10f   :  { %v1456_v45 = vpop.f32.mrf.mxu1 }
 0x110   :  { %v1457_v53 = vadd.f32 %v1456_v45, %v259_v44 }
 0x112   :  { %v1468_v41 = vpop.f32.mrf.mxu3 }
 0x113   :  { %v1496_v51 = vpop.f32.mrf.mxu2  ;;  %v1469_v52 = vadd.f32 %v1468_v41, %v1455_v47 }
 0x115   :  { %v1483_v58 = vadd.f32 %v1482_v42, %v1469_v52 }
 0x116   :  { %v1538_v49 = vpop.f32.mrf.mxu0 }
 0x117   :  { %v1497_v63 = vadd.f32 %v1496_v51, %v1483_v58 }
 0x11a   :  { %v1470_v50 = vpop.f32.mrf.mxu3 }
 0x11b   :  { %v1471_v59 = vadd.f32 %v1470_v50, %v1457_v53  ;;  %v1498_v2 = vpop.f32.mrf.mxu2 }
 0x11d   :  { %v1485_v0 = vadd.f32 %v1484_v43, %v1471_v59 }
 0x11e   :  { %v1540_v1 = vpop.f32.mrf.mxu0 }
 0x11f   :  { %v1499_v6 = vadd.f32 %v1498_v2, %v1485_v0 }
 0x127   :  { %v1510_v56 = vpop.f32.mrf.mxu1 }
 0x128   :  { %v1511_v3 = vadd.f32 %v1510_v56, %v1497_v63 }
 0x12a   :  { %v1566_v15 = vpop.f32.mrf.mxu0 }
 0x12f   :  { %v1512_v5 = vpop.f32.mrf.mxu1 }
 0x130   :  { %v1513_v9 = vadd.f32 %v1512_v5, %v1499_v6 }
 0x132   :  { %v1524_v62 = vpop.f32.mrf.mxu3  ;;  %v1568_v25 = vpop.f32.mrf.mxu0 }
 0x133   :  { %v1525_v7 = vadd.f32 %v1524_v62, %v1511_v3  ;;  %v1552_v18 = vpop.f32.mrf.mxu2 }
 0x134   :  { %v1553_v24 = vadd.f32 %v1552_v18, %v260_v23 }
 0x135   :  { %v1539_v12 = vadd.f32 %v1538_v49, %v1525_v7  ;;  %v3141_v49 = vld [vmem:[%s3436_s4] ss:$0 sm:$0xff]  ;;  %s1978_s4 = sshll.u32 %s3437_s5, 4  ;;  %s1979_s4 = int_to_ptr.hbm [resolvable:$true] %s1978_s4 }
 0x136   :  { %v1567_v27 = vadd.f32 %v1566_v15, %v1553_v24 }
 0x137   :  { %v1643_v19 = vmax.f32 %v1539_v12, 0.0 }
 0x13a   :  { %v1526_v11 = vpop.f32.mrf.mxu3 }
 0x13b   :  { %v1527_v13 = vadd.f32 %v1526_v11, %v1513_v9  ;;  %v1554_v26 = vpop.f32.mrf.mxu2 }
 0x13c   :  { %v1555_v30 = vadd.f32 %v1554_v26, %v260_v23 }
 0x13d   :  { %v1541_v14 = vadd.f32 %v1540_v1, %v1527_v13 }
 0x13e   :  { %v1569_v33 = vadd.f32 %v1568_v25, %v1555_v30 }
 0x13f   :  { %v1647_v20 = vmax.f32 %v1541_v14, 0.0 }
 0x141   :  { %v1651_v21 = vpack.c.bf16 %v1647_v20, %v1643_v19 }
 0x143   :  { %1949 = vmatmul.bf16.vlgmr.msrb.gmra.mxu2 %v1651_v21 }
 0x147   :  { %v1580_v55 = vpop.f32.mrf.mxu1 }
 0x148   :  { %v1581_v29 = vadd.f32 %v1580_v55, %v1567_v27 }
 0x14a   :  { %v1622_v32 = vpop.f32.mrf.mxu0 }
 0x14f   :  { %v1582_v28 = vpop.f32.mrf.mxu1 }
 0x150   :  { %v1583_v60 = vadd.f32 %v1582_v28, %v1569_v33 }
 0x152   :  { %v1594_v54 = vpop.f32.mrf.mxu3  ;;  %v1624_v39 = vpop.f32.mrf.mxu0 }
 0x153   :  { %v1608_v31 = vpop.f32.mrf.mxu2  ;;  %v1595_v8 = vadd.f32 %v1594_v54, %v1581_v29 }
 0x155   :  { %v1609_v34 = vadd.f32 %v1608_v31, %v1595_v8 }
 0x157   :  { %v1636_v35 = vpop.f32.mrf.mxu1  ;;  %v1623_v42 = vadd.f32 %v1622_v32, %v1609_v34 }
 0x159   :  { %v1637_v41 = vadd.f32 %v1636_v35, %v1623_v42 }
 0x15a   :  { %v1596_v37 = vpop.f32.mrf.mxu3 }
 0x15b   :  { %v1597_v16 = vadd.f32 %v1596_v37, %v1583_v60  ;;  %v1610_v36 = vpop.f32.mrf.mxu2  ;;  %v1644_v45 = vmax.f32 %v1637_v41, 0.0 }
 0x15d   :  { %v1611_v38 = vadd.f32 %v1610_v36, %v1597_v16 }
 0x15f   :  { %v1625_v40 = vadd.f32 %v1624_v39, %v1611_v38  ;;  %v1638_v43 = vpop.f32.mrf.mxu1 }
 0x161   :  { %v1639_v44 = vadd.f32 %v1638_v43, %v1625_v40 }
 0x163   :  { %v1648_v46 = vmax.f32 %v1639_v44, 0.0 }
 0x165   :  { %v1652_v47 = vpack.c.bf16 %v1648_v46, %v1644_v45 }
 0x167   :  { %1963 = vmatmul.bf16.vlgmr.msrb.gmra.mxu0 %v1652_v47 }
 0x172   :  { %v1922_v48 = vpop.f32.mrf.mxu3 }
 0x173   :  { %v1923_v52 = vadd.f32 %v3141_v49, %v1922_v48 }
 0x17a   :  { %v1924_v57 = vpop.f32.mrf.mxu3 }
 0x17b   :  { %v1925_v62 = vadd.f32 %v3141_v49, %v1924_v57 }
 0x18a   :  { %v1936_v51 = vpop.f32.mrf.mxu1 }
 0x18b   :  { %v1937_v53 = vadd.f32 %v1936_v51, %v1923_v52 }
 0x192   :  { %v1938_v61 = vpop.f32.mrf.mxu1 }
 0x193   :  { %v1939_v0 = vadd.f32 %v1938_v61, %v1925_v62 }
 0x1c6   :  { %v1950_v50 = vpop.f32.mrf.mxu2 }
 0x1c7   :  { %v1951_v56 = vadd.f32 %v1950_v50, %v1937_v53 }
 0x1ce   :  { %v1952_v63 = vpop.f32.mrf.mxu2 }
 0x1cf   :  { %v1953_v1 = vadd.f32 %v1952_v63, %v1939_v0 }
 0x1e4   :  { %v1964_v58 = vpop.f32.mrf.mxu0 }
 0x1e5   :  { %v1965_v59 = vadd.f32 %v1964_v58, %v1951_v56 }
 0x1e7   :  { %1970 = vst.msk [vmem:[#allocation5] sm:$0xff] %vm1969_vm1, %v1965_v59 }
 0x1ec   :  { %v1966_v2 = vpop.f32.mrf.mxu0 }
 0x1ed   :  { %v1967_v3 = vadd.f32 %v1966_v2, %v1953_v1 }
 0x1ef   :  { %1971 = vst.msk [vmem:[#allocation5 + $0x8] sm:$0xff] %vm1969_vm1, %v1967_v3 }
 0x1f0   :  { %1984 = dma.vmem_to_hbm [thread:$0]  %s1977_s11, 256, %s1979_s4, [#allocation4], %s3198_s14, %s3198_s14, %s3199_s15  }
 0x1f1   :  { %3192 = dma.done.wait [#allocation4], 256  }
 0x1f2   :  { %3193 = vsyncadd [#allocation4], 4294967040 }
 0x1f3   :  { %1989 = vsyncpa [#allocation3], 1 }
 0x1f4   :  { %1990 = vsyncpa [#allocation4], 1 }

</bundles_post_ra>
